<compile_context>
chip_gen: v5e
topology: v5e:2x2
jax: 0.10.0
libtpu: 0.0.40
codegen_flags: <defaults>
</compile_context>

<pallas_src>
import functools

import numpy as np
import jax
import jax.numpy as jnp
from jax.experimental import pallas as pl
from jax.experimental.pallas import tpu as pltpu


def _round_up(n, m):
    return ((n + m - 1) // m) * m


# ----------------------------------------------------------------------------
# Kernel 1: block-sparse hop propagation  out = A_norm @ h
#   A_norm stored as int8 (per-row scale); h bf16; f32 accumulate; bf16 out.
#   Grid: (row tiles, max nonzero blocks per row tile).
# ----------------------------------------------------------------------------
def _make_prop_kernel(tile, h_resident):
    def kernel(idx_ref, cnt_ref, adj_ref, scale_ref, h_ref, o_ref, acc_ref):
        i = pl.program_id(0)
        k = pl.program_id(1)

        @pl.when(k == 0)
        def _():
            acc_ref[...] = jnp.zeros_like(acc_ref)

        @pl.when(k < cnt_ref[i])                 # skip padded (empty) block slots
        def _():
            a = adj_ref[...].astype(jnp.bfloat16)   # int8 dequant is just a VPU cast
            if h_resident:
                start = pl.multiple_of(idx_ref[i, k] * tile, tile)
                hblk = h_ref[pl.ds(start, tile), :]
            else:
                hblk = h_ref[...]
            acc_ref[...] += jnp.dot(a, hblk, preferred_element_type=jnp.float32)

        @pl.when(k == pl.num_programs(1) - 1)
        def _():
            # per-row dequant scale applied once in the epilogue
            o_ref[...] = (acc_ref[...] * scale_ref[...]).astype(o_ref.dtype)

    return kernel


def adj_matmul(adj_q, adj_scale, blk_idx, blk_cnt, h, *, tile,
               h_resident_bytes=4 * 1024 * 1024,
               vmem_limit_bytes=32 * 1024 * 1024):
    n_pad = adj_q.shape[0]
    d = h.shape[1]
    r = n_pad // tile
    kmax = blk_idx.shape[1]
    # Keep h fully resident in VMEM (fetched once) when it is small enough;
    # otherwise stream the (tile, D) block selected by the SMEM block index.
    h_resident = (n_pad * d * h.dtype.itemsize) <= h_resident_bytes

    if h_resident:
        h_spec = pl.BlockSpec((n_pad, d), lambda i, k, idx, cnt: (0, 0))
    else:
        h_spec = pl.BlockSpec((tile, d), lambda i, k, idx, cnt: (idx[i, k], 0))

    return pl.pallas_call(
        _make_prop_kernel(tile, h_resident),
        out_shape=jax.ShapeDtypeStruct((n_pad, d), jnp.bfloat16),
        grid_spec=pltpu.PrefetchScalarGridSpec(
            num_scalar_prefetch=2,
            grid=(r, kmax),
            in_specs=[
                pl.BlockSpec((tile, tile), lambda i, k, idx, cnt: (i, idx[i, k])),
                pl.BlockSpec((tile, 1), lambda i, k, idx, cnt: (i, 0)),
                h_spec,
            ],
            out_specs=pl.BlockSpec((tile, d), lambda i, k, idx, cnt: (i, 0)),
            scratch_shapes=[pltpu.VMEM((tile, d), jnp.float32)],
        ),
        compiler_params=pltpu.CompilerParams(
            dimension_semantics=("parallel", "arbitrary"),
            vmem_limit_bytes=vmem_limit_bytes),
    )(blk_idx, blk_cnt, adj_q, adj_scale, h)


# ----------------------------------------------------------------------------
# Kernel 2: TAGConv combine + ReLU + fused JumpingKnowledge 'max'
#   acc = sum_k hop_k @ W_k ; act = relu(acc + b)
#   h_out = act (bf16, feeds next layer) ; jk_out = max(jk_prev, act) (f32, aliased)
#   Single grid axis (row tiles); hops passed separately (no HBM hop stack).
# ----------------------------------------------------------------------------
def _make_combine_kernel(n_hops):
    def kernel(*refs):
        hop_refs = refs[:n_hops]
        w_ref, b_ref, prev_ref, h_out_ref, jk_out_ref = refs[n_hops:]
        acc = jnp.dot(hop_refs[0][...], w_ref[0],
                      preferred_element_type=jnp.float32)
        for k in range(1, n_hops):                 # unrolled hop reduction (in vregs)
            acc = acc + jnp.dot(hop_refs[k][...], w_ref[k],
                                preferred_element_type=jnp.float32)
        act = jnp.maximum(acc + b_ref[...], 0.0)   # bias + ReLU (dropout = identity)
        h_out_ref[...] = act.astype(h_out_ref.dtype)
        jk_out_ref[...] = jnp.maximum(prev_ref[...], act)
    return kernel


def tag_combine_relu_jkmax(hops, w, b, jk_prev, *, tm,
                           vmem_limit_bytes=32 * 1024 * 1024):
    n_hops = len(hops)
    n_pad, din = hops[0].shape
    kp1, _, dout = w.shape
    assert kp1 == n_hops
    in_specs = [pl.BlockSpec((tm, din), lambda i: (i, 0)) for _ in range(n_hops)]
    in_specs += [
        pl.BlockSpec((kp1, din, dout), lambda i: (0, 0, 0)),   # small W, resident
        pl.BlockSpec((1, dout), lambda i: (0, 0)),
        pl.BlockSpec((tm, dout), lambda i: (i, 0)),
    ]
    h_out, jk_out = pl.pallas_call(
        _make_combine_kernel(n_hops),
        out_shape=(jax.ShapeDtypeStruct((n_pad, dout), jnp.bfloat16),
                   jax.ShapeDtypeStruct((n_pad, dout), jnp.float32)),
        grid=(n_pad // tm,),
        in_specs=in_specs,
        out_specs=(pl.BlockSpec((tm, dout), lambda i: (i, 0)),
                   pl.BlockSpec((tm, dout), lambda i: (i, 0))),
        input_output_aliases={n_hops + 2: 1},     # JK running max updated in place
        compiler_params=pltpu.CompilerParams(
            dimension_semantics=("parallel",),
            vmem_limit_bytes=vmem_limit_bytes),
    )(*hops, w, b, jk_prev)
    return h_out, jk_out


# ----------------------------------------------------------------------------
# Kernel 3: edge scoring MLP (bf16 compute, f32 accumulate), tiled over edges.
#   p = src*dst ; hidden Linear+ReLU layers ; last layer as lane-dense (1, tE) row
#   via dot_general contracting on H (no transpose of the (tE, H) activation).
# ----------------------------------------------------------------------------
def _make_edge_mlp_kernel(num_layers):
    def kernel(*refs):
        s_ref, d_ref = refs[0], refs[1]
        o_ref = refs[-1]
        wb = refs[2:-1]
        h = s_ref[...] * d_ref[...]                          # bf16 product
        for li in range(num_layers - 1):                     # hidden Linear + ReLU
            w = wb[2 * li][...]                              # bf16 (Din, H)
            bias = wb[2 * li + 1][...]                       # f32  (1, H)
            z = jnp.dot(h, w, preferred_element_type=jnp.float32) + bias
            h = jnp.maximum(z, 0.0).astype(jnp.bfloat16)
        w_last = wb[2 * (num_layers - 1)][...]               # bf16 (1, H)
        b_last = wb[2 * (num_layers - 1) + 1][...]           # f32  (1, 1)
        # (1, H) x (tE, H) contracted over H -> lane-dense (1, tE), no transpose.
        o_ref[...] = jax.lax.dot_general(
            w_last, h, dimension_numbers=(((1,), (1,)), ((), ())),
            preferred_element_type=jnp.float32) + b_last
    return kernel


def edge_mlp(src, dst, lin_params, *, edge_tile=512):
    E, D = src.shape
    tE = min(edge_tile, _round_up(E, 128))
    E_pad = _round_up(E, tE)
    if E_pad != E:
        pad = ((0, E_pad - E), (0, 0))
        src = jnp.pad(src, pad)
        dst = jnp.pad(dst, pad)

    num_layers = len(lin_params)
    assert lin_params[-1][0].shape[1] == 1, "final MLP layer must map to a scalar"

    ops = [src, dst]
    in_specs = [pl.BlockSpec((tE, D), lambda i: (i, 0)),
                pl.BlockSpec((tE, D), lambda i: (i, 0))]
    for li, (w, b) in enumerate(lin_params):
        if li < num_layers - 1:
            ops += [w, b]
            in_specs += [pl.BlockSpec(w.shape, lambda i: (0, 0)),
                         pl.BlockSpec(b.shape, lambda i: (0, 0))]
        else:
            w_t = w.T                          # (1, H)
            ops += [w_t, b]                    # b is (1, 1)
            in_specs += [pl.BlockSpec(w_t.shape, lambda i: (0, 0)),
                         pl.BlockSpec(b.shape, lambda i: (0, 0))]

    out = pl.pallas_call(
        _make_edge_mlp_kernel(num_layers),
        out_shape=jax.ShapeDtypeStruct((1, E_pad), jnp.float32),
        grid=(E_pad // tE,),
        in_specs=in_specs,
        out_specs=pl.BlockSpec((1, tE), lambda i: (0, i)),
        compiler_params=pltpu.CompilerParams(dimension_semantics=("parallel",)),
    )(*ops)
    return out[0, :E]                          # (E,)  == .squeeze(1) of the torch code


# ----------------------------------------------------------------------------
# Host-side adjacency preprocessing: pad to tile multiple (exact, zero rows/cols),
# int8 quantize per row, and build block-sparsity metadata for scalar prefetch.
# ----------------------------------------------------------------------------
def preprocess_adjacency(adj_norm, tile):
    a = np.asarray(jax.device_get(adj_norm), dtype=np.float32)
    n = a.shape[0]
    n_pad = _round_up(n, tile)
    a_p = np.zeros((n_pad, n_pad), np.float32)
    a_p[:n, :n] = a
    row_max = np.abs(a_p).max(axis=1)
    scale = np.where(row_max > 0.0, row_max / 127.0, 1.0).astype(np.float32)
    a_q = np.rint(a_p / scale[:, None]).astype(np.int8)

    r = n_pad // tile
    nz = np.any(a_q.reshape(r, tile, r, tile) != 0, axis=(1, 3))   # (r, r) bool
    cnt = nz.sum(axis=1).astype(np.int32)
    kmax = max(int(cnt.max()), 1)
    idx = np.zeros((r, kmax), np.int32)
    for i in range(r):
        nzi = np.nonzero(nz[i])[0].astype(np.int32)
        if nzi.size:
            idx[i, :nzi.size] = nzi
            idx[i, nzi.size:] = nzi[-1]   # repeat last index -> padded steps add no DMA
    return (jnp.asarray(a_q), jnp.asarray(scale[:, None]),
            jnp.asarray(idx), jnp.asarray(cnt))


# ----------------------------------------------------------------------------
# Model glue (parameter setup, adjacency normalization, gather) in plain JAX.
# ----------------------------------------------------------------------------
def glorot(key, shape):
    fan_in, fan_out = shape[0], shape[1]
    bound = jnp.sqrt(6.0 / (fan_in + fan_out))
    return jax.random.uniform(key, shape, jnp.float32, -bound, bound)


def init_params(key, num_nodes, embed_dim, gnn_in_dim, gnn_hidden_dim,
                gnn_out_dim, gnn_num_layers, mlp_in_dim, mlp_hidden_dim,
                mlp_out_dim, mlp_num_layers, K):
    keys = jax.random.split(key, 1 + gnn_num_layers + mlp_num_layers)
    ki = iter(keys)
    params = {}
    params["emb"] = glorot(next(ki), (num_nodes, embed_dim))     # xavier_uniform_
    conv_dims = ([(gnn_in_dim, gnn_hidden_dim)]
                 + [(gnn_hidden_dim, gnn_hidden_dim)] * (gnn_num_layers - 2)
                 + [(gnn_hidden_dim, gnn_out_dim)])
    params["convs"] = []
    for din, dout in conv_dims:
        # TAGConv weight stored hop-major as [K+1, din, dout].
        w = glorot(next(ki), ((K + 1) * din, dout)).reshape(K + 1, din, dout)
        b = jnp.zeros((1, dout), jnp.float32)
        params["convs"].append((w, b))
    lin_dims = ([(mlp_in_dim, mlp_hidden_dim)]
                + [(mlp_hidden_dim, mlp_hidden_dim)] * (mlp_num_layers - 2)
                + [(mlp_hidden_dim, mlp_out_dim)])
    params["lins"] = []
    for din, dout in lin_dims:
        w = glorot(next(ki), (din, dout))
        b = jnp.zeros((1, dout), jnp.float32)
        params["lins"].append((w, b))
    return params


def gcn_norm_dense(adj):
    """Symmetric normalization D^-1/2 A D^-1/2 (no self loops, like TAGConv)."""
    deg = jnp.sum(adj, axis=1)
    d_inv_sqrt = jnp.where(deg > 0, 1.0 / jnp.sqrt(jnp.maximum(deg, 1e-12)), 0.0)
    return adj * d_inv_sqrt[:, None] * d_inv_sqrt[None, :]


def dea_gnn_jk_forward(params, x_feature, adj_q, adj_scale, blk_idx, blk_cnt,
                       edge_label_index, *, node_tile=128, edge_tile=512):
    # out = cat([emb.weight, x_feature], dim=1), zero-padded to the tiled node count.
    feats = jnp.concatenate([params["emb"], x_feature], axis=1)
    n = feats.shape[0]
    n_pad = adj_q.shape[0]
    if n_pad != n:
        feats = jnp.pad(feats, ((0, n_pad - n), (0, 0)))
    h = feats.astype(jnp.bfloat16)

    dout = params["convs"][0][0].shape[-1]          # all conv outputs share width
    # ReLU outputs are >= 0, so a zero-initialised running max is an exact identity
    # for JumpingKnowledge 'max'; it is updated in-place (aliased) by each conv.
    jk = jnp.zeros((n_pad, dout), jnp.float32)

    for (w, b) in params["convs"]:
        k_hops = w.shape[0] - 1
        hops = [h]
        for _ in range(k_hops):                     # h, A h, A^2 h, ...
            hops.append(adj_matmul(adj_q, adj_scale, blk_idx, blk_cnt,
                                   hops[-1], tile=node_tile))
        # TAGConv -> ReLU -> dropout(identity, eval) -> JK-max fused; no hop stack.
        h, jk = tag_combine_relu_jkmax(hops, w.astype(jnp.bfloat16), b, jk,
                                       tm=node_tile)

    out = jk.astype(jnp.bfloat16)                   # halves endpoint-gather bytes
    # TODO(synk): move this endpoint gather in-kernel (PrefetchScalarGridSpec with the
    # edge indices in SMEM + DMA row gather) to avoid materializing [E, D] src/dst.
    src = jnp.take(out, edge_label_index[0], axis=0)
    dst = jnp.take(out, edge_label_index[1], axis=0)
    lins_bf16 = [(w.astype(jnp.bfloat16), b) for (w, b) in params["lins"]]
    # TODO(synk): dropout (p=0.5) is identity in eval mode; training-mode RNG dropout
    # is not implemented in-kernel.
    return edge_mlp(src, dst, lins_bf16, edge_tile=edge_tile)


if __name__ == "__main__":
    # Small, 128-aligned configuration (lane-dense feature dims).
    num_nodes = 256
    embed_dim = 64
    feat_dim = 64
    gnn_in_dim = embed_dim + feat_dim      # 128
    gnn_hidden_dim = 128
    gnn_out_dim = 128                      # must equal hidden for JK 'max'
    gnn_num_layers = 3
    K = 2
    mlp_in_dim = gnn_hidden_dim            # 128 (product of embeddings)
    mlp_hidden_dim = 128
    mlp_out_dim = 1
    mlp_num_layers = 2
    num_edges = 256

    # Small tiles here so the grids are >1 at toy shapes (and both v7x TensorCores
    # get a row tile); for real node/edge counts use 512/1024-ish tiles.
    node_tile = 128
    edge_tile = 128

    assert gnn_out_dim == gnn_hidden_dim, "JK 'max' needs equal conv output widths"
    assert mlp_out_dim == 1

    root = jax.random.PRNGKey(0)
    k_param, k_feat, k_adj, k_edge = jax.random.split(root, 4)

    params = init_params(k_param, num_nodes, embed_dim, gnn_in_dim,
                         gnn_hidden_dim, gnn_out_dim, gnn_num_layers,
                         mlp_in_dim, mlp_hidden_dim, mlp_out_dim,
                         mlp_num_layers, K)

    x_feature = jax.random.normal(k_feat, (num_nodes, feat_dim), jnp.float32)

    # Random symmetric adjacency (no self loops), then gcn_norm.
    a = (jax.random.uniform(k_adj, (num_nodes, num_nodes)) < 0.05).astype(jnp.float32)
    a = jnp.maximum(a, a.T)
    a = a * (1.0 - jnp.eye(num_nodes, dtype=jnp.float32))
    adj_norm = gcn_norm_dense(a)

    # Host-side: pad + int8-quantize adjacency, build block-sparsity metadata.
    adj_q, adj_scale, blk_idx, blk_cnt = preprocess_adjacency(adj_norm, node_tile)

    edge_label_index = jax.random.randint(k_edge, (2, num_edges), 0, num_nodes)

    fwd = jax.jit(functools.partial(dea_gnn_jk_forward,
                                    node_tile=node_tile, edge_tile=edge_tile))
    y = fwd(params, x_feature, adj_q, adj_scale, blk_idx, blk_cnt, edge_label_index)
    y = jax.block_until_ready(y)
    assert y.shape == (num_edges,) and y.dtype == jnp.float32
    assert bool(jnp.all(jnp.isfinite(y)))
    print("KERNEL_OK")
</pallas_src>

<mosaic_0001>
module attributes {stable_mosaic.version = 11 : i64} {
  func.func @kernel(%arg0: i32, %arg1: memref<128x128xbf16, #tpu.memory_space<vmem>>, %arg2: memref<128x128xbf16, #tpu.memory_space<vmem>>, %arg3: memref<128x128xbf16, #tpu.memory_space<vmem>>, %arg4: memref<3x128x128xbf16, #tpu.memory_space<vmem>>, %arg5: memref<1x128xf32, #tpu.memory_space<vmem>>, %arg6: memref<128x128xf32, #tpu.memory_space<vmem>>, %arg7: memref<128x128xbf16, #tpu.memory_space<vmem>>, %arg8: memref<128x128xf32, #tpu.memory_space<vmem>>) attributes {dimension_semantics = [#tpu.dimension_semantics<parallel>], iteration_bounds = array<i64: 2>, scalar_prefetch = 0 : i64, scratch_operands = 0 : i64, tpu.core_type = #tpu.core_type<tc>, window_params = [{transform_indices = @transform_0, window_bounds = array<i64: 128, 128>}, {transform_indices = @transform_1, window_bounds = array<i64: 128, 128>}, {transform_indices = @transform_2, window_bounds = array<i64: 128, 128>}, {pipeline_mode = #tpu.pipeline_mode<synchronous>, transform_indices = @transform_3, window_bounds = array<i64: 3, 128, 128>}, {pipeline_mode = #tpu.pipeline_mode<synchronous>, transform_indices = @transform_4, window_bounds = array<i64: 1, 128>}, {transform_indices = @transform_5, window_bounds = array<i64: 128, 128>}, {transform_indices = @transform_6, window_bounds = array<i64: 128, 128>}, {transform_indices = @transform_7, window_bounds = array<i64: 128, 128>}]} {
    %c0 = arith.constant 0 : index
    %c0_0 = arith.constant 0 : index
    %0 = vector.load %arg1[%c0, %c0_0] : memref<128x128xbf16, #tpu.memory_space<vmem>>, vector<128x128xbf16>
    %c0_1 = arith.constant 0 : index
    %c0_2 = arith.constant 0 : index
    %c0_3 = arith.constant 0 : index
    %1 = vector.load %arg4[%c0_1, %c0_2, %c0_3] : memref<3x128x128xbf16, #tpu.memory_space<vmem>>, vector<1x128x128xbf16>
    %2 = vector.shape_cast %1 : vector<1x128x128xbf16> to vector<128x128xbf16>
    %cst = arith.constant dense<0.000000e+00> : vector<128x128xf32>
    %3 = tpu.matmul %0, %2, %cst {dimension_numbers = #tpu.dot_dimension_numbers<[1], [0], [0], [1], [0, 0, 1, 1], [], []>} : vector<128x128xbf16>, vector<128x128xbf16>, vector<128x128xf32> -> vector<128x128xf32>
    %c0_4 = arith.constant 0 : index
    %c0_5 = arith.constant 0 : index
    %4 = vector.load %arg2[%c0_4, %c0_5] : memref<128x128xbf16, #tpu.memory_space<vmem>>, vector<128x128xbf16>
    %c1 = arith.constant 1 : index
    %c0_6 = arith.constant 0 : index
    %c0_7 = arith.constant 0 : index
    %5 = vector.load %arg4[%c1, %c0_6, %c0_7] : memref<3x128x128xbf16, #tpu.memory_space<vmem>>, vector<1x128x128xbf16>
    %6 = vector.shape_cast %5 : vector<1x128x128xbf16> to vector<128x128xbf16>
    %cst_8 = arith.constant dense<0.000000e+00> : vector<128x128xf32>
    %7 = tpu.matmul %4, %6, %cst_8 {dimension_numbers = #tpu.dot_dimension_numbers<[1], [0], [0], [1], [0, 0, 1, 1], [], []>} : vector<128x128xbf16>, vector<128x128xbf16>, vector<128x128xf32> -> vector<128x128xf32>
    %8 = arith.addf %3, %7 : vector<128x128xf32>
    %c0_9 = arith.constant 0 : index
    %c0_10 = arith.constant 0 : index
    %9 = vector.load %arg3[%c0_9, %c0_10] : memref<128x128xbf16, #tpu.memory_space<vmem>>, vector<128x128xbf16>
    %c2 = arith.constant 2 : index
    %c0_11 = arith.constant 0 : index
    %c0_12 = arith.constant 0 : index
    %10 = vector.load %arg4[%c2, %c0_11, %c0_12] : memref<3x128x128xbf16, #tpu.memory_space<vmem>>, vector<1x128x128xbf16>
    %11 = vector.shape_cast %10 : vector<1x128x128xbf16> to vector<128x128xbf16>
    %cst_13 = arith.constant dense<0.000000e+00> : vector<128x128xf32>
    %12 = tpu.matmul %9, %11, %cst_13 {dimension_numbers = #tpu.dot_dimension_numbers<[1], [0], [0], [1], [0, 0, 1, 1], [], []>} : vector<128x128xbf16>, vector<128x128xbf16>, vector<128x128xf32> -> vector<128x128xf32>
    %13 = arith.addf %8, %12 : vector<128x128xf32>
    %c0_14 = arith.constant 0 : index
    %c0_15 = arith.constant 0 : index
    %14 = vector.load %arg5[%c0_14, %c0_15] : memref<1x128xf32, #tpu.memory_space<vmem>>, vector<1x128xf32>
    %15 = vector.broadcast %14 : vector<1x128xf32> to vector<128x128xf32>
    %16 = arith.addf %13, %15 : vector<128x128xf32>
    %cst_16 = arith.constant 0.000000e+00 : f32
    %17 = vector.broadcast %cst_16 : f32 to vector<128x128xf32>
    %18 = arith.maximumf %16, %17 : vector<128x128xf32>
    %19 = arith.truncf %18 : vector<128x128xf32> to vector<128x128xbf16>
    %c0_17 = arith.constant 0 : index
    %c0_18 = arith.constant 0 : index
    %20 = vector.load %arg7[%c0_17, %c0_18] : memref<128x128xbf16, #tpu.memory_space<vmem>>, vector<128x128xbf16>
    tpu.vector_store %arg7[%c0_17, %c0_18], %19 {strides = array<i32>} : memref<128x128xbf16, #tpu.memory_space<vmem>>, vector<128x128xbf16>,
    %c0_19 = arith.constant 0 : index
    %c0_20 = arith.constant 0 : index
    %21 = vector.load %arg6[%c0_19, %c0_20] : memref<128x128xf32, #tpu.memory_space<vmem>>, vector<128x128xf32>
    %22 = arith.maximumf %21, %18 : vector<128x128xf32>
    %c0_21 = arith.constant 0 : index
    %c0_22 = arith.constant 0 : index
    %23 = vector.load %arg8[%c0_21, %c0_22] : memref<128x128xf32, #tpu.memory_space<vmem>>, vector<128x128xf32>
    tpu.vector_store %arg8[%c0_21, %c0_22], %22 {strides = array<i32>} : memref<128x128xf32, #tpu.memory_space<vmem>>, vector<128x128xf32>,
    return
  }
  func.func @transform_0(%arg0: i32) -> (i32, i32) {
    %c0_i32 = arith.constant 0 : i32
    %c0_i32_0 = arith.constant 0 : i32
    return %arg0, %c0_i32 : i32, i32
  }
  func.func @transform_1(%arg0: i32) -> (i32, i32) {
    %c0_i32 = arith.constant 0 : i32
    %c0_i32_0 = arith.constant 0 : i32
    return %arg0, %c0_i32 : i32, i32
  }
  func.func @transform_2(%arg0: i32) -> (i32, i32) {
    %c0_i32 = arith.constant 0 : i32
    %c0_i32_0 = arith.constant 0 : i32
    return %arg0, %c0_i32 : i32, i32
  }
  func.func @transform_3(%arg0: i32) -> (i32, i32, i32) {
    %c0_i32 = arith.constant 0 : i32
    %c0_i32_0 = arith.constant 0 : i32
    %c0_i32_1 = arith.constant 0 : i32
    %c0_i32_2 = arith.constant 0 : i32
    return %c0_i32, %c0_i32_0, %c0_i32_1 : i32, i32, i32
  }
  func.func @transform_4(%arg0: i32) -> (i32, i32) {
    %c0_i32 = arith.constant 0 : i32
    %c0_i32_0 = arith.constant 0 : i32
    %c0_i32_1 = arith.constant 0 : i32
    return %c0_i32, %c0_i32_0 : i32, i32
  }
  func.func @transform_5(%arg0: i32) -> (i32, i32) {
    %c0_i32 = arith.constant 0 : i32
    %c0_i32_0 = arith.constant 0 : i32
    return %arg0, %c0_i32 : i32, i32
  }
  func.func @transform_6(%arg0: i32) -> (i32, i32) {
    %c0_i32 = arith.constant 0 : i32
    %c0_i32_0 = arith.constant 0 : i32
    return %arg0, %c0_i32 : i32, i32
  }
  func.func @transform_7(%arg0: i32) -> (i32, i32) {
    %c0_i32 = arith.constant 0 : i32
    %c0_i32_0 = arith.constant 0 : i32
    return %arg0, %c0_i32 : i32, i32
  }
}

module attributes {stable_mosaic.version = 11 : i64} {
  func.func @kernel(%arg0: i32, %arg1: memref<128x128xbf16, #tpu.memory_space<vmem>>, %arg2: memref<128x128xbf16, #tpu.memory_space<vmem>>, %arg3: memref<128x128xbf16, #tpu.memory_space<vmem>>, %arg4: memref<3x128x128xbf16, #tpu.memory_space<vmem>>, %arg5: memref<1x128xf32, #tpu.memory_space<vmem>>, %arg6: memref<128x128xf32, #tpu.memory_space<vmem>>, %arg7: memref<128x128xbf16, #tpu.memory_space<vmem>>, %arg8: memref<128x128xf32, #tpu.memory_space<vmem>>) attributes {dimension_semantics = [#tpu.dimension_semantics<parallel>], iteration_bounds = array<i64: 2>, scalar_prefetch = 0 : i64, scratch_operands = 0 : i64, tpu.core_type = #tpu.core_type<tc>, window_params = [{transform_indices = @transform_0, window_bounds = array<i64: 128, 128>}, {transform_indices = @transform_1, window_bounds = array<i64: 128, 128>}, {transform_indices = @transform_2, window_bounds = array<i64: 128, 128>}, {pipeline_mode = #tpu.pipeline_mode<synchronous>, transform_indices = @transform_3, window_bounds = array<i64: 3, 128, 128>}, {pipeline_mode = #tpu.pipeline_mode<synchronous>, transform_indices = @transform_4, window_bounds = array<i64: 1, 128>}, {transform_indices = @transform_5, window_bounds = array<i64: 128, 128>}, {transform_indices = @transform_6, window_bounds = array<i64: 128, 128>}, {transform_indices = @transform_7, window_bounds = array<i64: 128, 128>}]} {
    %c0 = arith.constant 0 : index
    %c0_0 = arith.constant 0 : index
    %0 = vector.load %arg1[%c0, %c0_0] : memref<128x128xbf16, #tpu.memory_space<vmem>>, vector<128x128xbf16>
    %c0_1 = arith.constant 0 : index
    %c0_2 = arith.constant 0 : index
    %c0_3 = arith.constant 0 : index
    %1 = vector.load %arg4[%c0_1, %c0_2, %c0_3] : memref<3x128x128xbf16, #tpu.memory_space<vmem>>, vector<1x128x128xbf16>
    %2 = vector.shape_cast %1 : vector<1x128x128xbf16> to vector<128x128xbf16>
    %cst = arith.constant dense<0.000000e+00> : vector<128x128xf32>
    %3 = tpu.matmul %0, %2, %cst {dimension_numbers = #tpu.dot_dimension_numbers<[1], [0], [0], [1], [0, 0, 1, 1], [], []>} : vector<128x128xbf16>, vector<128x128xbf16>, vector<128x128xf32> -> vector<128x128xf32>
    %c0_4 = arith.constant 0 : index
    %c0_5 = arith.constant 0 : index
    %4 = vector.load %arg2[%c0_4, %c0_5] : memref<128x128xbf16, #tpu.memory_space<vmem>>, vector<128x128xbf16>
    %c1 = arith.constant 1 : index
    %c0_6 = arith.constant 0 : index
    %c0_7 = arith.constant 0 : index
    %5 = vector.load %arg4[%c1, %c0_6, %c0_7] : memref<3x128x128xbf16, #tpu.memory_space<vmem>>, vector<1x128x128xbf16>
    %6 = vector.shape_cast %5 : vector<1x128x128xbf16> to vector<128x128xbf16>
    %cst_8 = arith.constant dense<0.000000e+00> : vector<128x128xf32>
    %7 = tpu.matmul %4, %6, %cst_8 {dimension_numbers = #tpu.dot_dimension_numbers<[1], [0], [0], [1], [0, 0, 1, 1], [], []>} : vector<128x128xbf16>, vector<128x128xbf16>, vector<128x128xf32> -> vector<128x128xf32>
    %8 = arith.addf %3, %7 : vector<128x128xf32>
    %c0_9 = arith.constant 0 : index
    %c0_10 = arith.constant 0 : index
    %9 = vector.load %arg3[%c0_9, %c0_10] : memref<128x128xbf16, #tpu.memory_space<vmem>>, vector<128x128xbf16>
    %c2 = arith.constant 2 : index
    %c0_11 = arith.constant 0 : index
    %c0_12 = arith.constant 0 : index
    %10 = vector.load %arg4[%c2, %c0_11, %c0_12] : memref<3x128x128xbf16, #tpu.memory_space<vmem>>, vector<1x128x128xbf16>
    %11 = vector.shape_cast %10 : vector<1x128x128xbf16> to vector<128x128xbf16>
    %cst_13 = arith.constant dense<0.000000e+00> : vector<128x128xf32>
    %12 = tpu.matmul %9, %11, %cst_13 {dimension_numbers = #tpu.dot_dimension_numbers<[1], [0], [0], [1], [0, 0, 1, 1], [], []>} : vector<128x128xbf16>, vector<128x128xbf16>, vector<128x128xf32> -> vector<128x128xf32>
    %13 = arith.addf %8, %12 : vector<128x128xf32>
    %c0_14 = arith.constant 0 : index
    %c0_15 = arith.constant 0 : index
    %14 = vector.load %arg5[%c0_14, %c0_15] : memref<1x128xf32, #tpu.memory_space<vmem>>, vector<1x128xf32>
    %15 = vector.broadcast %14 : vector<1x128xf32> to vector<128x128xf32>
    %16 = arith.addf %13, %15 : vector<128x128xf32>
    %cst_16 = arith.constant 0.000000e+00 : f32
    %17 = vector.broadcast %cst_16 : f32 to vector<128x128xf32>
    %18 = arith.maximumf %16, %17 : vector<128x128xf32>
    %19 = arith.truncf %18 : vector<128x128xf32> to vector<128x128xbf16>
    %c0_17 = arith.constant 0 : index
    %c0_18 = arith.constant 0 : index
    %20 = vector.load %arg7[%c0_17, %c0_18] : memref<128x128xbf16, #tpu.memory_space<vmem>>, vector<128x128xbf16>
    tpu.vector_store %arg7[%c0_17, %c0_18], %19 {strides = array<i32>} : memref<128x128xbf16, #tpu.memory_space<vmem>>, vector<128x128xbf16>,
    %c0_19 = arith.constant 0 : index
    %c0_20 = arith.constant 0 : index
    %21 = vector.load %arg6[%c0_19, %c0_20] : memref<128x128xf32, #tpu.memory_space<vmem>>, vector<128x128xf32>
    %22 = arith.maximumf %21, %18 : vector<128x128xf32>
    %c0_21 = arith.constant 0 : index
    %c0_22 = arith.constant 0 : index
    %23 = vector.load %arg8[%c0_21, %c0_22] : memref<128x128xf32, #tpu.memory_space<vmem>>, vector<128x128xf32>
    tpu.vector_store %arg8[%c0_21, %c0_22], %22 {strides = array<i32>} : memref<128x128xf32, #tpu.memory_space<vmem>>, vector<128x128xf32>,
    return
  }
  func.func @transform_0(%arg0: i32) -> (i32, i32) {
    %c0_i32 = arith.constant 0 : i32
    %c0_i32_0 = arith.constant 0 : i32
    return %arg0, %c0_i32 : i32, i32
  }
  func.func @transform_1(%arg0: i32) -> (i32, i32) {
    %c0_i32 = arith.constant 0 : i32
    %c0_i32_0 = arith.constant 0 : i32
    return %arg0, %c0_i32 : i32, i32
  }
  func.func @transform_2(%arg0: i32) -> (i32, i32) {
    %c0_i32 = arith.constant 0 : i32
    %c0_i32_0 = arith.constant 0 : i32
    return %arg0, %c0_i32 : i32, i32
  }
  func.func @transform_3(%arg0: i32) -> (i32, i32, i32) {
    %c0_i32 = arith.constant 0 : i32
    %c0_i32_0 = arith.constant 0 : i32
    %c0_i32_1 = arith.constant 0 : i32
    %c0_i32_2 = arith.constant 0 : i32
    return %c0_i32, %c0_i32_0, %c0_i32_1 : i32, i32, i32
  }
  func.func @transform_4(%arg0: i32) -> (i32, i32) {
    %c0_i32 = arith.constant 0 : i32
    %c0_i32_0 = arith.constant 0 : i32
    %c0_i32_1 = arith.constant 0 : i32
    return %c0_i32, %c0_i32_0 : i32, i32
  }
  func.func @transform_5(%arg0: i32) -> (i32, i32) {
    %c0_i32 = arith.constant 0 : i32
    %c0_i32_0 = arith.constant 0 : i32
    return %arg0, %c0_i32 : i32, i32
  }
  func.func @transform_6(%arg0: i32) -> (i32, i32) {
    %c0_i32 = arith.constant 0 : i32
    %c0_i32_0 = arith.constant 0 : i32
    return %arg0, %c0_i32 : i32, i32
  }
  func.func @transform_7(%arg0: i32) -> (i32, i32) {
    %c0_i32 = arith.constant 0 : i32
    %c0_i32_0 = arith.constant 0 : i32
    return %arg0, %c0_i32 : i32, i32
  }
}

module attributes {stable_mosaic.version = 11 : i64} {
  func.func @kernel(%arg0: i32, %arg1: i32, %arg2: memref<2x2xi32, #tpu.memory_space<smem>>, %arg3: memref<2xi32, #tpu.memory_space<smem>>, %arg4: memref<128x128xi8, #tpu.memory_space<vmem>>, %arg5: memref<128x1xf32, #tpu.memory_space<vmem>>, %arg6: memref<256x128xbf16, #tpu.memory_space<vmem>>, %arg7: memref<128x128xbf16, #tpu.memory_space<vmem>>, %arg8: memref<128x128xf32, #tpu.memory_space<vmem>>) attributes {dimension_semantics = [#tpu.dimension_semantics<parallel>, #tpu.dimension_semantics<arbitrary>], iteration_bounds = array<i64: 2, 2>, scalar_prefetch = 2 : i64, scratch_operands = 1 : i64, tpu.core_type = #tpu.core_type<tc>, window_params = [{transform_indices = @transform_0, window_bounds = array<i64: 128, 128>}, {transform_indices = @transform_1, window_bounds = array<i64: 128, 1>}, {pipeline_mode = #tpu.pipeline_mode<synchronous>, transform_indices = @transform_2, window_bounds = array<i64: 256, 128>}, {transform_indices = @transform_3, window_bounds = array<i64: 128, 128>}]} {
    %c0_i32 = arith.constant 0 : i32
    %0 = arith.cmpi eq, %arg1, %c0_i32 : i32
    %1 = arith.extui %0 : i1 to i32
    %c0_i32_0 = arith.constant 0 : i32
    %2 = arith.cmpi ne, %1, %c0_i32_0 : i32
    scf.if %2 {
      %cst = arith.constant 0.000000e+00 : f32
      %11 = vector.broadcast %cst : f32 to vector<128x128xf32>
      %c0 = arith.constant 0 : index
      %c0_3 = arith.constant 0 : index
      %12 = vector.load %arg8[%c0, %c0_3] : memref<128x128xf32, #tpu.memory_space<vmem>>, vector<128x128xf32>
      tpu.vector_store %arg8[%c0, %c0_3], %11 {strides = array<i32>} : memref<128x128xf32, #tpu.memory_space<vmem>>, vector<128x128xf32>,
    } else {
    }
    %3 = arith.index_cast %arg0 : i32 to index
    %4 = memref.load %arg3[%3] : memref<2xi32, #tpu.memory_space<smem>>
    %5 = arith.cmpi slt, %arg1, %4 : i32
    %6 = arith.extui %5 : i1 to i32
    %c0_i32_1 = arith.constant 0 : i32
    %7 = arith.cmpi ne, %6, %c0_i32_1 : i32
    scf.if %7 {
      %c0 = arith.constant 0 : index
      %c0_3 = arith.constant 0 : index
      %11 = vector.load %arg4[%c0, %c0_3] : memref<128x128xi8, #tpu.memory_space<vmem>>, vector<128x128xi8>
      %12 = arith.sitofp %11 : vector<128x128xi8> to vector<128x128xbf16>
      %13 = arith.index_cast %arg0 : i32 to index
      %14 = arith.index_cast %arg1 : i32 to index
      %15 = memref.load %arg2[%13, %14] : memref<2x2xi32, #tpu.memory_space<smem>>
      %c128_i32 = arith.constant 128 : i32
      %16 = arith.muli %15, %c128_i32 : i32
      %17 = tpu.assume_multiple %16, 128 : i32
      %18 = arith.index_cast %17 : i32 to index
      %c0_4 = arith.constant 0 : index
      %19 = vector.load %arg6[%18, %c0_4] : memref<256x128xbf16, #tpu.memory_space<vmem>>, vector<128x128xbf16>
      %c0_5 = arith.constant 0 : index
      %c0_6 = arith.constant 0 : index
      %20 = vector.load %arg8[%c0_5, %c0_6] : memref<128x128xf32, #tpu.memory_space<vmem>>, vector<128x128xf32>
      %cst = arith.constant dense<0.000000e+00> : vector<128x128xf32>
      %21 = tpu.matmul %12, %19, %cst {dimension_numbers = #tpu.dot_dimension_numbers<[1], [0], [0], [1], [0, 0, 1, 1], [], []>} : vector<128x128xbf16>, vector<128x128xbf16>, vector<128x128xf32> -> vector<128x128xf32>
      %22 = arith.addf %20, %21 : vector<128x128xf32>
      %c0_7 = arith.constant 0 : index
      %c0_8 = arith.constant 0 : index
      %23 = vector.load %arg8[%c0_7, %c0_8] : memref<128x128xf32, #tpu.memory_space<vmem>>, vector<128x128xf32>
      tpu.vector_store %arg8[%c0_7, %c0_8], %22 {strides = array<i32>} : memref<128x128xf32, #tpu.memory_space<vmem>>, vector<128x128xf32>,
    } else {
    }
    %c1_i32 = arith.constant 1 : i32
    %8 = arith.cmpi eq, %arg1, %c1_i32 : i32
    %9 = arith.extui %8 : i1 to i32
    %c0_i32_2 = arith.constant 0 : i32
    %10 = arith.cmpi ne, %9, %c0_i32_2 : i32
    scf.if %10 {
      %c0 = arith.constant 0 : index
      %c0_3 = arith.constant 0 : index
      %11 = vector.load %arg8[%c0, %c0_3] : memref<128x128xf32, #tpu.memory_space<vmem>>, vector<128x128xf32>
      %c0_4 = arith.constant 0 : index
      %c0_5 = arith.constant 0 : index
      %12 = vector.load %arg5[%c0_4, %c0_5] : memref<128x1xf32, #tpu.memory_space<vmem>>, vector<128x1xf32>
      %13 = vector.broadcast %12 : vector<128x1xf32> to vector<128x128xf32>
      %14 = arith.mulf %11, %13 : vector<128x128xf32>
      %15 = arith.truncf %14 : vector<128x128xf32> to vector<128x128xbf16>
      %c0_6 = arith.constant 0 : index
      %c0_7 = arith.constant 0 : index
      %16 = vector.load %arg7[%c0_6, %c0_7] : memref<128x128xbf16, #tpu.memory_space<vmem>>, vector<128x128xbf16>
      tpu.vector_store %arg7[%c0_6, %c0_7], %15 {strides = array<i32>} : memref<128x128xbf16, #tpu.memory_space<vmem>>, vector<128x128xbf16>,
    } else {
    }
    return
  }
  func.func @transform_0(%arg0: i32, %arg1: i32, %arg2: memref<2x2xi32, #tpu.memory_space<smem>>, %arg3: memref<2xi32, #tpu.memory_space<smem>>) -> (i32, i32) {
    %0 = arith.index_cast %arg0 : i32 to index
    %1 = arith.index_cast %arg1 : i32 to index
    %2 = memref.load %arg2[%0, %1] : memref<2x2xi32, #tpu.memory_space<smem>>
    %c0_i32 = arith.constant 0 : i32
    return %arg0, %2 : i32, i32
  }
  func.func @transform_1(%arg0: i32, %arg1: i32, %arg2: memref<2x2xi32, #tpu.memory_space<smem>>, %arg3: memref<2xi32, #tpu.memory_space<smem>>) -> (i32, i32) {
    %c0_i32 = arith.constant 0 : i32
    %c0_i32_0 = arith.constant 0 : i32
    return %arg0, %c0_i32 : i32, i32
  }
  func.func @transform_2(%arg0: i32, %arg1: i32, %arg2: memref<2x2xi32, #tpu.memory_space<smem>>, %arg3: memref<2xi32, #tpu.memory_space<smem>>) -> (i32, i32) {
    %c0_i32 = arith.constant 0 : i32
    %c0_i32_0 = arith.constant 0 : i32
    %c0_i32_1 = arith.constant 0 : i32
    return %c0_i32, %c0_i32_0 : i32, i32
  }
  func.func @transform_3(%arg0: i32, %arg1: i32, %arg2: memref<2x2xi32, #tpu.memory_space<smem>>, %arg3: memref<2xi32, #tpu.memory_space<smem>>) -> (i32, i32) {
    %c0_i32 = arith.constant 0 : i32
    %c0_i32_0 = arith.constant 0 : i32
    return %arg0, %c0_i32 : i32, i32
  }
}

module attributes {stable_mosaic.version = 11 : i64} {
  func.func @kernel(%arg0: i32, %arg1: memref<128x128xbf16, #tpu.memory_space<vmem>>, %arg2: memref<128x128xbf16, #tpu.memory_space<vmem>>, %arg3: memref<128x128xbf16, #tpu.memory_space<vmem>>, %arg4: memref<1x128xf32, #tpu.memory_space<vmem>>, %arg5: memref<1x128xbf16, #tpu.memory_space<vmem>>, %arg6: memref<1x1xf32, #tpu.memory_space<vmem>>, %arg7: memref<1x128xf32, #tpu.memory_space<vmem>>) attributes {dimension_semantics = [#tpu.dimension_semantics<parallel>], iteration_bounds = array<i64: 2>, scalar_prefetch = 0 : i64, scratch_operands = 0 : i64, tpu.core_type = #tpu.core_type<tc>, window_params = [{transform_indices = @transform_0, window_bounds = array<i64: 128, 128>}, {transform_indices = @transform_1, window_bounds = array<i64: 128, 128>}, {pipeline_mode = #tpu.pipeline_mode<synchronous>, transform_indices = @transform_2, window_bounds = array<i64: 128, 128>}, {pipeline_mode = #tpu.pipeline_mode<synchronous>, transform_indices = @transform_3, window_bounds = array<i64: 1, 128>}, {pipeline_mode = #tpu.pipeline_mode<synchronous>, transform_indices = @transform_4, window_bounds = array<i64: 1, 128>}, {pipeline_mode = #tpu.pipeline_mode<synchronous>, transform_indices = @transform_5, window_bounds = array<i64: 1, 1>}, {transform_indices = @transform_6, window_bounds = array<i64: 1, 128>}]} {
    %c0 = arith.constant 0 : index
    %c0_0 = arith.constant 0 : index
    %0 = vector.load %arg1[%c0, %c0_0] : memref<128x128xbf16, #tpu.memory_space<vmem>>, vector<128x128xbf16>
    %c0_1 = arith.constant 0 : index
    %c0_2 = arith.constant 0 : index
    %1 = vector.load %arg2[%c0_1, %c0_2] : memref<128x128xbf16, #tpu.memory_space<vmem>>, vector<128x128xbf16>
    %2 = arith.mulf %0, %1 : vector<128x128xbf16>
    %c0_3 = arith.constant 0 : index
    %c0_4 = arith.constant 0 : index
    %3 = vector.load %arg3[%c0_3, %c0_4] : memref<128x128xbf16, #tpu.memory_space<vmem>>, vector<128x128xbf16>
    %c0_5 = arith.constant 0 : index
    %c0_6 = arith.constant 0 : index
    %4 = vector.load %arg4[%c0_5, %c0_6] : memref<1x128xf32, #tpu.memory_space<vmem>>, vector<1x128xf32>
    %cst = arith.constant dense<0.000000e+00> : vector<128x128xf32>
    %5 = tpu.matmul %2, %3, %cst {dimension_numbers = #tpu.dot_dimension_numbers<[1], [0], [0], [1], [0, 0, 1, 1], [], []>} : vector<128x128xbf16>, vector<128x128xbf16>, vector<128x128xf32> -> vector<128x128xf32>
    %6 = vector.broadcast %4 : vector<1x128xf32> to vector<128x128xf32>
    %7 = arith.addf %5, %6 : vector<128x128xf32>
    %cst_7 = arith.constant 0.000000e+00 : f32
    %8 = vector.broadcast %cst_7 : f32 to vector<128x128xf32>
    %9 = arith.maximumf %7, %8 : vector<128x128xf32>
    %10 = arith.truncf %9 : vector<128x128xf32> to vector<128x128xbf16>
    %c0_8 = arith.constant 0 : index
    %c0_9 = arith.constant 0 : index
    %11 = vector.load %arg5[%c0_8, %c0_9] : memref<1x128xbf16, #tpu.memory_space<vmem>>, vector<1x128xbf16>
    %c0_10 = arith.constant 0 : index
    %c0_11 = arith.constant 0 : index
    %12 = vector.load %arg6[%c0_10, %c0_11] : memref<1x1xf32, #tpu.memory_space<vmem>>, vector<1x1xf32>
    %cst_12 = arith.constant dense<0.000000e+00> : vector<1x128xf32>
    %13 = tpu.matmul %11, %10, %cst_12 {dimension_numbers = #tpu.dot_dimension_numbers<[1], [1], [0], [0], [0, 0, 1, 0], [], []>} : vector<1x128xbf16>, vector<128x128xbf16>, vector<1x128xf32> -> vector<1x128xf32>
    %14 = vector.broadcast %12 : vector<1x1xf32> to vector<1x128xf32>
    %15 = arith.addf %13, %14 : vector<1x128xf32>
    %c0_13 = arith.constant 0 : index
    %c0_14 = arith.constant 0 : index
    %16 = vector.load %arg7[%c0_13, %c0_14] : memref<1x128xf32, #tpu.memory_space<vmem>>, vector<1x128xf32>
    tpu.vector_store %arg7[%c0_13, %c0_14], %15 {strides = array<i32>} : memref<1x128xf32, #tpu.memory_space<vmem>>, vector<1x128xf32>,
    return
  }
  func.func @transform_0(%arg0: i32) -> (i32, i32) {
    %c0_i32 = arith.constant 0 : i32
    %c0_i32_0 = arith.constant 0 : i32
    return %arg0, %c0_i32 : i32, i32
  }
  func.func @transform_1(%arg0: i32) -> (i32, i32) {
    %c0_i32 = arith.constant 0 : i32
    %c0_i32_0 = arith.constant 0 : i32
    return %arg0, %c0_i32 : i32, i32
  }
  func.func @transform_2(%arg0: i32) -> (i32, i32) {
    %c0_i32 = arith.constant 0 : i32
    %c0_i32_0 = arith.constant 0 : i32
    %c0_i32_1 = arith.constant 0 : i32
    return %c0_i32, %c0_i32_0 : i32, i32
  }
  func.func @transform_3(%arg0: i32) -> (i32, i32) {
    %c0_i32 = arith.constant 0 : i32
    %c0_i32_0 = arith.constant 0 : i32
    %c0_i32_1 = arith.constant 0 : i32
    return %c0_i32, %c0_i32_0 : i32, i32
  }
  func.func @transform_4(%arg0: i32) -> (i32, i32) {
    %c0_i32 = arith.constant 0 : i32
    %c0_i32_0 = arith.constant 0 : i32
    %c0_i32_1 = arith.constant 0 : i32
    return %c0_i32, %c0_i32_0 : i32, i32
  }
  func.func @transform_5(%arg0: i32) -> (i32, i32) {
    %c0_i32 = arith.constant 0 : i32
    %c0_i32_0 = arith.constant 0 : i32
    %c0_i32_1 = arith.constant 0 : i32
    return %c0_i32, %c0_i32_0 : i32, i32
  }
  func.func @transform_6(%arg0: i32) -> (i32, i32) {
    %c0_i32 = arith.constant 0 : i32
    %c0_i32_0 = arith.constant 0 : i32
    return %c0_i32, %arg0 : i32, i32
  }
}

</mosaic_0001>

<bundles_post_ra>
// kernel: dea_gnn_jk_forward.18
= control target key start
LH: loop header
LB: loop body
LE: loop exit
PB: predicated region body
PF: predicated region fallthrough
CT: control target
= control target key end

     0   :  { %13 = vsyncpa [#allocation3], 0  ;;  %s2018_s0 = inlined_call_operand.vmem [shape: bf16[256,128], index: 0, kind: input, shape index: {}]   ;;  %s2019_s1 = inlined_call_operand.vmem [shape: bf16[256,128], index: 1, kind: input, shape index: {}]   ;;  %s2020_s2 = inlined_call_operand.vmem [shape: bf16[256,128], index: 2, kind: input, shape index: {}]   ;;  %s2021_s3 = inlined_call_operand.vmem [shape: bf16[3,128,128], index: 3, kind: input, shape index: {}]   ;;  %s2022_s4 = inlined_call_operand.vmem [shape: f32[1,128], index: 4, kind: input, shape index: {}]   ;;  %s2023_s5 = inlined_call_operand.vmem [shape: f32[256,128], index: 5, kind: input, shape index: {}, may-alias: {5,7}]   ;;  %s2024_s6 = inlined_call_operand.hbm [shape: bf16[256,128], index: 6, kind: output, shape index: {0}]   ;;  %s2025_s7 = inlined_call_operand.vmem [shape: f32[256,128], index: 7, kind: output, shape index: {1}, may-alias: {5,7}]  }
   0x1   :  { %15 = vsyncpa [#allocation3 + $0x1], 0  ;;  %s1685_s24 = smov 0   ;;  %s1687_s25 = smov 0  }
   0x2   :  { %s1689_s26 = smov 0   ;;  %s1691_s27 = smov 0  }
   0x3 LB: > { %s1706_s28 = sadd.s32 4294967295, %s1641_s27   ;;  %s1173_s29 = sadd.s32 4294967294, %s1641_s27   ;;  %s1641_s27 = sphi %s1691_s27, %s2031_s27   ;;  %s1637_s26 = sphi %s1689_s26, %s2030_s26   ;;  %s1633_s25 = sphi %s1687_s25, %s2029_s25   ;;  %s1629_s24 = sphi %s1685_s24, %s2028_s24  }
   0x4   : > { %s1710_s30 = sadd.s32 1, %s1641_s27   ;;  %s174_s8 = sadd.s32 1, %s1637_s26 }
   0x5   : > { %s171_s9 = ssub.s32 %s1641_s27, %s1710_s30  ;;  %p184_p0 = scmp.ne.s32.totalorder %s1637_s26, %s1633_s25 }
   0x6   : > { %p172_p1 = scmp.eq.s32.totalorder %s171_s9, 0  ;;  %p185_p2 = scmp.eq.s32.totalorder %s1706_s28, 1 }
   0x7   : > { %p190_p3 = scmp.ne.s32.totalorder %s1633_s25, %s1629_s24  ;;  %p191_p4 = scmp.eq.s32.totalorder %s1173_s29, 1 }
   0x8   : > { %s1721_s10 = scalar_select %p172_p1, %s1637_s26, %s174_s8  }
   0x9   : > { %p1723_p5 = por %p185_p2, %p184_p0  ;;  %p1727_p6 = por %p191_p4, %p190_p3 }
   0xa   : > { %p1176_p7 = scmp.ge.s32.totalorder %s1641_s27, 1  ;;  %p277_p8 = scmp.lt.s32.totalorder %s1641_s27, 3 }
   0xc   : > { %p278_p9 = pnand %p1176_p7, %p277_p8 }
   0xd   : > { %s1178_s23 = sshll.u32 (!%p278_p9), %s1706_s28, 4  ;;  %s319_s13 = sand.u32 (!%p278_p9), 1, %s1633_s25  }
   0xe   : > { %281 = sbr.rel (%p278_p9) target bundleno = 286 (0x11e), region = 44  ;;  %p330_p10 = scmp.lt.s32.totalorder (!%p278_p9), %s1178_s23, 31 }
   0xf   : > { %s1465_s17 = sshll.u32 (!%p278_p9), %s1706_s28, 6  ;;  %s1026_s22 = scalar_lea.sflag (!%p278_p9), [#allocation3], %s319_s13 }
  0x10   : > { %s1042_s19 = scalar_lea.hbm (!%p278_p9), %s2024_s6, %s1465_s17 }
  0x11   : > { %s1045_s21 = sshll.u32 (!%p278_p9), %s1042_s19, 4  ;;  %s1046_s21 = int_to_ptr.hbm [resolvable:$true] %s1045_s21 }
  0x13   : > { %v1448_v0 = vld [vmem:[%s2021_s3 + $0x78] sm:$0xff]  ;;  %v1447_v3 = vld [vmem:[%s2021_s3 + $0x70] sm:$0xff]  ;;  %v1446_v6 = vld [vmem:[%s2021_s3 + $0x68] sm:$0xff]  ;;  %s2033_s23 = smov (!%p330_p10, %s1178_s23), 31 }
  0x14   : > { %v1739_v1 = vld [vmem:[%s2021_s3 + $0x38] sm:$0xff]  ;;  %521 = vmatpush.bf16.msra.mxu0 %v1448_v0  ;;  %1513 = vmatpush.bf16.msra.mxu3 %v1448_v0  ;;  %v1754_v4 = vld [vmem:[%s2021_s3 + $0x30] sm:$0xff]  ;;  %v1430_v7 = vld [vmem:[%s2021_s3 + $0x28] sm:$0xff]  ;;  %s1179_s15 = sshll.u32 %s2033_s23, 2 }
  0x15   : > { %v1744_v2 = vld [vmem:[%s2021_s3 + $0xb8] sm:$0xff]  ;;  %666 = vmatpush.bf16.msra.mxu1 %v1739_v1  ;;  %v1759_v5 = vld [vmem:[%s2021_s3 + $0xb0] sm:$0xff]  ;;  %v1772_v8 = vld [vmem:[%s2021_s3 + $0xa8] sm:$0xff]  ;;  %s1830_s20 = scalar_lea.vmem %s2019_s1, %s1179_s15  ;;  %s1841_s14 = scalar_lea.vmem %s2018_s0, %s1179_s15 }
  0x16   : > { %844 = vmatpush.bf16.msra.mxu2 %v1744_v2  ;;  %v1445_v9 = vld [vmem:[%s2021_s3 + $0x60] sm:$0xff]  ;;  %v1444_v12 = vld [vmem:[%s2021_s3 + $0x58] sm:$0xff]  ;;  %v1443_v15 = vld [vmem:[%s2021_s3 + $0x50] sm:$0xff]  ;;  %s1846_s18 = scalar_lea.vmem %s2020_s2, %s1179_s15  ;;  %s1185_s15 = sshll.u32 %s2033_s23, 3 }
  0x17   : > { %v1429_v10 = vld [vmem:[%s2021_s3 + $0x20] sm:$0xff]  ;;  %v1428_v13 = vld [vmem:[%s2021_s3 + $0x18] sm:$0xff]  ;;  %v1427_v16 = vld [vmem:[%s2021_s3 + $0x10] sm:$0xff]  ;;  %s351_s29 = scalar_lea.vmem %s2023_s5, %s1185_s15  ;;  %s1911_s9 = scalar_lea.vmem %s2025_s7, %s1185_s15 }
  0x18   : > { %522 = vmatpush.bf16.msra.mxu0 %v1447_v3  ;;  %1514 = vmatpush.bf16.msra.mxu3 %v1447_v3  ;;  %v1784_v11 = vld [vmem:[%s2021_s3 + $0xa0] sm:$0xff]  ;;  %v1797_v14 = vld [vmem:[%s2021_s3 + $0x98] sm:$0xff]  ;;  %v1809_v17 = vld [vmem:[%s2021_s3 + $0x90] sm:$0xff] }
  0x19   : > { %667 = vmatpush.bf16.msra.mxu1 %v1754_v4  ;;  %v1442_v18 = vld [vmem:[%s2021_s3 + $0x48] sm:$0xff]  ;;  %v1441_v21 = vld [vmem:[%s2021_s3 + $0x40] sm:$0xff]  ;;  %v1439_v25 = vld [vmem:[%s1830_s20 + $0x30] sm:$0xff] }
  0x1a   : > { %845 = vmatpush.bf16.msra.mxu2 %v1759_v5  ;;  %v1426_v19 = vld [vmem:[%s2021_s3 + $0x8] sm:$0xff]  ;;  %v1425_v22 = vld [vmem:[%s2021_s3] sm:$0xff]  ;;  %v1440_v29 = vld [vmem:[%s1830_s20 + $0x38] sm:$0xff] }
  0x1b   : > { %v1458_v20 = vld [vmem:[%s2021_s3 + $0x88] sm:$0xff]  ;;  %v1457_v23 = vld [vmem:[%s2021_s3 + $0x80] sm:$0xff]  ;;  %v1435_v32 = vld [vmem:[%s1830_s20 + $0x10] sm:$0xff] }
  0x1c   : > { %523 = vmatpush.bf16.msra.mxu0 %v1446_v6  ;;  %1515 = vmatpush.bf16.msra.mxu3 %v1446_v6  ;;  %v1433_v24 = vld [vmem:[%s1830_s20] sm:$0xff]  ;;  %v1434_v28 = vld [vmem:[%s1830_s20 + $0x8] sm:$0xff]  ;;  %v1423_v33 = vld [vmem:[%s1841_s14 + $0x30] sm:$0xff] }
  0x1d   : > { %668 = vmatpush.bf16.msra.mxu1 %v1430_v7  ;;  %v1417_v26 = vld [vmem:[%s1841_s14] sm:$0xff]  ;;  %v1418_v30 = vld [vmem:[%s1841_s14 + $0x8] sm:$0xff]  ;;  %v1419_v34 = vld [vmem:[%s1841_s14 + $0x10] sm:$0xff] }
  0x1e   : > { %846 = vmatpush.bf16.msra.mxu2 %v1772_v8  ;;  %v1449_v27 = vld [vmem:[%s1846_s18] sm:$0xff]  ;;  %v1450_v31 = vld [vmem:[%s1846_s18 + $0x8] sm:$0xff]  ;;  %v1451_v35 = vld [vmem:[%s1846_s18 + $0x10] sm:$0xff] }
  0x1f   : > { %v1436_v36 = vld [vmem:[%s1830_s20 + $0x18] sm:$0xff]  ;;  %v1437_v40 = vld [vmem:[%s1830_s20 + $0x20] sm:$0xff]  ;;  %v1455_v41 = vld [vmem:[%s1846_s18 + $0x30] sm:$0xff] }
  0x20   : > { %524 = vmatpush.bf16.msra.mxu0 %v1445_v9  ;;  %1516 = vmatpush.bf16.msra.mxu3 %v1445_v9  ;;  %v1424_v37 = vld [vmem:[%s1841_s14 + $0x38] sm:$0xff]  ;;  %v1421_v42 = vld [vmem:[%s1841_s14 + $0x20] sm:$0xff]  ;;  %v1438_v44 = vld [vmem:[%s1830_s20 + $0x28] sm:$0xff]  ;;  %s1593_s20 = sshra.s32 %s1046_s21, 4  ;;  %s1594_s20 = int_to_ptr.hbm [resolvable:$true] %s1593_s20 }
  0x21   : > { %669 = vmatpush.bf16.msra.mxu1 %v1429_v10  ;;  %v1420_v38 = vld [vmem:[%s1841_s14 + $0x18] sm:$0xff]  ;;  %v1453_v43 = vld [vmem:[%s1846_s18 + $0x20] sm:$0xff]  ;;  %v1422_v46 = vld [vmem:[%s1841_s14 + $0x28] sm:$0xff]  ;;  %s1177_s14 = sshll.u32 %s319_s13, 6  ;;  %p1600_p0 = scmp.lt.s32.totalorder %s1594_s20, %s2024_s6 }
  0x22   : > { %847 = vmatpush.bf16.msra.mxu2 %v1784_v11  ;;  %v1452_v39 = vld [vmem:[%s1846_s18 + $0x18] sm:$0xff]  ;;  %v1454_v47 = vld [vmem:[%s1846_s18 + $0x28] sm:$0xff]  ;;  %v1886_v52 = vld [vmem:[%s2022_s4] ss:$0 sm:$0xff]  ;;  %s1928_s16 = scalar_lea.vmem [#allocation2], %s1177_s14  ;;  %s1599_s14 = scalar_lea.hbm %s2024_s6, 128 }
  0x23   : > { %v1456_v45 = vld [vmem:[%s1846_s18 + $0x38] sm:$0xff]  ;;  %v977_v58 = vld [vmem:[%s351_s29] sm:$0xff]  ;;  %v978_v59 = vld [vmem:[%s351_s29 + $0x8] sm:$0xff]  ;;  %s1043_s28 = sshll.u32 %s1928_s16, 4  ;;  %s1044_s28 = int_to_ptr.vmem [resolvable:$true] %s1043_s28 }
  0x24   : > { %525 = vmatpush.bf16.msra.mxu0 %v1444_v12  ;;  %1517 = vmatpush.bf16.msra.mxu3 %v1444_v12  ;;  %v979_v60 = vld [vmem:[%s351_s29 + $0x10] sm:$0xff]  ;;  %v980_v61 = vld [vmem:[%s351_s29 + $0x18] sm:$0xff]  ;;  %v981_v62 = vld [vmem:[%s351_s29 + $0x20] sm:$0xff] }
  0x25   : > { %670 = vmatpush.bf16.msra.mxu1 %v1428_v13  ;;  %v1892_v63 = vld [vmem:[%s351_s29 + $0x28] sm:$0xff]  ;;  %v1894_v0 = vld [vmem:[%s351_s29 + $0x30] sm:$0xff]  ;;  %v1900_v3 = vld [vmem:[%s351_s29 + $0x60] sm:$0xff] }
  0x26   : > { %848 = vmatpush.bf16.msra.mxu2 %v1797_v14  ;;  %v1904_v6 = vld [vmem:[%s351_s29 + $0x68] sm:$0xff]  ;;  %v1915_v9 = vld [vmem:[%s351_s29 + $0x58] sm:$0xff] }
  0x28   : > { %526 = vmatpush.bf16.msra.mxu0 %v1443_v15  ;;  %1518 = vmatpush.bf16.msra.mxu3 %v1443_v15 }
  0x29   : > { %671 = vmatpush.bf16.msra.mxu1 %v1427_v16 }
  0x2a   : > { %849 = vmatpush.bf16.msra.mxu2 %v1809_v17 }
  0x2c   : > { %527 = vmatpush.bf16.msra.mxu0 %v1442_v18  ;;  %1519 = vmatpush.bf16.msra.mxu3 %v1442_v18 }
  0x2d   : > { %672 = vmatpush.bf16.msra.mxu1 %v1426_v19 }
  0x2e   : > { %850 = vmatpush.bf16.msra.mxu2 %v1458_v20 }
  0x30   : > { %528 = vmatpush.bf16.msra.mxu0 %v1441_v21  ;;  %1520 = vmatpush.bf16.msra.mxu3 %v1441_v21 }
  0x31   : > { %673 = vmatpush.bf16.msra.mxu1 %v1425_v22 }
  0x32   : > { %851 = vmatpush.bf16.msra.mxu2 %v1457_v23 }
  0x33   : > { %529 = vmatmul.bf16.vlgmr.msra.gmra.mxu0 %v1433_v24  ;;  %559 = vmatmul.bf16.vlgmr.msra.gmra.mxu3 %v1439_v25 }
  0x34   : > { %1521 = vmatpush.bf16.msrb.mxu3 %v1739_v1  ;;  %674 = vmatmul.bf16.vlgmr.msra.gmra.mxu1 %v1417_v26  ;;  %v1896_v1 = vld [vmem:[%s351_s29 + $0x38] sm:$0xff] }
  0x35   : > { %852 = vmatmul.bf16.vlgmr.msra.gmra.mxu2 %v1449_v27 }
  0x38   : > { %1522 = vmatpush.bf16.msrb.mxu3 %v1754_v4 }
  0x3c   : > { %1523 = vmatpush.bf16.msrb.mxu3 %v1430_v7  ;;  %v1906_v7 = vld [vmem:[%s351_s29 + $0x50] sm:$0xff] }
  0x40   : > { %1524 = vmatpush.bf16.msrb.mxu3 %v1429_v10  ;;  %v1917_v10 = vld [vmem:[%s351_s29 + $0x78] sm:$0xff] }
  0x43   : > { %534 = vmatmul.bf16.gmra.mxu0 %v1434_v28  ;;  %564 = vmatmul.bf16.gmra.mxu3 %v1440_v29 }
  0x44   : > { %1525 = vmatpush.bf16.msrb.mxu3 %v1428_v13  ;;  %679 = vmatmul.bf16.gmra.mxu1 %v1418_v30 }
  0x45   : > { %857 = vmatmul.bf16.gmra.mxu2 %v1450_v31 }
  0x48   : > { %1526 = vmatpush.bf16.msrb.mxu3 %v1427_v16 }
  0x4c   : > { %1527 = vmatpush.bf16.msrb.mxu3 %v1426_v19 }
  0x50   : > { %1528 = vmatpush.bf16.msrb.mxu3 %v1425_v22 }
  0x53   : > { %539 = vmatmul.bf16.gmra.mxu0 %v1435_v32  ;;  %704 = vmatmul.bf16.vlgmr.msrb.gmra.mxu3 %v1423_v33 }
  0x54   : > { %1529 = vmatpush.bf16.msra.mxu3 %v1744_v2  ;;  %684 = vmatmul.bf16.gmra.mxu1 %v1419_v34  ;;  %v1898_v2 = vld [vmem:[%s351_s29 + $0x40] sm:$0xff] }
  0x55   : > { %862 = vmatmul.bf16.gmra.mxu2 %v1451_v35 }
  0x58   : > { %1530 = vmatpush.bf16.msra.mxu3 %v1759_v5  ;;  %v1902_v5 = vld [vmem:[%s351_s29 + $0x48] sm:$0xff] }
  0x5c   : > { %1531 = vmatpush.bf16.msra.mxu3 %v1772_v8  ;;  %v1913_v8 = vld [vmem:[%s351_s29 + $0x70] sm:$0xff]  ;;  %s1595_s29 = scalar_lea.hbm %s1594_s20, 64 }
  0x5d   : > { %p1596_p11 = scmp.ne.s32.totalorder %s1594_s20, %s1595_s29  ;;  %p1601_p1 = scmp.lt.s32.totalorder %s1599_s14, %s1595_s29 }
  0x5f   : > { %p1597_p12 = pnand %p1596_p11, %p1723_p5  ;;  %p1602_p2 = por %p1601_p1, %p1600_p0 }
  0x60   : > { %1532 = vmatpush.bf16.msra.mxu3 %v1784_v11 }
  0x61   : > { %p1598_p13 = pneg %p1597_p12 }
  0x63   : > { %544 = vmatmul.bf16.gmra.mxu0 %v1436_v36  ;;  %709 = vmatmul.bf16.gmra.mxu3 %v1424_v37  ;;  %p1603_p3 = pnand %p1602_p2, %p1598_p13 }
  0x64   : > { %1533 = vmatpush.bf16.msra.mxu3 %v1797_v14  ;;  %689 = vmatmul.bf16.gmra.mxu1 %v1420_v38 }
  0x65   : > { %867 = vmatmul.bf16.gmra.mxu2 %v1452_v39 }
  0x68   : > { %1534 = vmatpush.bf16.msra.mxu3 %v1809_v17 }
  0x6c   : > { %1535 = vmatpush.bf16.msra.mxu3 %v1458_v20 }
  0x70   : > { %1536 = vmatpush.bf16.msra.mxu3 %v1457_v23 }
  0x73   : > { %549 = vmatmul.bf16.gmra.mxu0 %v1437_v40  ;;  %882 = vmatmul.bf16.vlgmr.msra.gmra.mxu3 %v1455_v41 }
  0x74   : > { %694 = vmatmul.bf16.gmra.mxu1 %v1421_v42 }
  0x75   : > { %872 = vmatmul.bf16.gmra.mxu2 %v1453_v43 }
  0x83   : > { %554 = vmatmul.bf16.gmra.mxu0 %v1438_v44  ;;  %887 = vmatmul.bf16.gmra.mxu3 %v1456_v45 }
  0x84   : > { %699 = vmatmul.bf16.gmra.mxu1 %v1422_v46 }
  0x85   : > { %877 = vmatmul.bf16.gmra.mxu2 %v1454_v47 }
  0xb0   : > { %v530_v48 = vpop.f32.mrf.mxu0 }
  0xb1   : > { %v675_v49 = vpop.f32.mrf.mxu1 }
  0xb2   : > { %v676_v50 = vadd.f32 %v675_v49, %v530_v48 }
  0xb6   : > { %v1881_v51 = vpop.f32.mrf.mxu3 }
  0xb8   : > { %v853_v53 = vpop.f32.mrf.mxu2  ;;  %v532_v55 = vpop.f32.mrf.mxu0 }
  0xb9   : > { %v893_v54 = vadd.f32 %v853_v53, %v676_v50  ;;  %v677_v56 = vpop.f32.mrf.mxu1 }
  0xba   : > { %v678_v12 = vadd.f32 %v677_v56, %v532_v55 }
  0xbb   : > { %v913_v57 = vadd.f32 %v1886_v52, %v893_v54 }
  0xbd   : > { %v929_v4 = vmax.f32 %v913_v57, 0.0 }
  0xbe   : > { %v1919_v13 = vpop.f32.mrf.mxu3 }
  0xbf   : > { %v993_v11 = vmax.f32 %v977_v58, %v929_v4 }
  0xc0   : > { %v855_v14 = vpop.f32.mrf.mxu2  ;;  %v535_v16 = vpop.f32.mrf.mxu0 }
  0xc1   : > { %v894_v15 = vadd.f32 %v855_v14, %v678_v12  ;;  %1009 = vst [vmem:[%s1911_s9] sm:$0xff] %v993_v11  ;;  %v680_v17 = vpop.f32.mrf.mxu1 }
  0xc2   : > { %v681_v20 = vadd.f32 %v680_v17, %v535_v16 }
  0xc3   : > { %v914_v18 = vadd.f32 %v1886_v52, %v894_v15 }
  0xc5   : > { %v930_v19 = vmax.f32 %v914_v18, 0.0 }
  0xc6   : > { %v1926_v23 = vpop.f32.mrf.mxu3 }
  0xc7   : > { %v1469_v21 = vpack.c.bf16 %v930_v19, %v929_v4  ;;  %v994_v22 = vmax.f32 %v978_v59, %v930_v19 }
  0xc8   : > { %v858_v24 = vpop.f32.mrf.mxu2  ;;  %v537_v26 = vpop.f32.mrf.mxu0 }
  0xc9   : > { %1470 = vst [vmem:[%s1928_s16] sm:$0xff] %v1469_v21   ;;  %v895_v25 = vadd.f32 %v858_v24, %v681_v20  ;;  %v682_v27 = vpop.f32.mrf.mxu1 }
  0xca   : > { %1010 = vst [vmem:[%s1911_s9 + $0x8] sm:$0xff] %v994_v22  ;;  %v683_v31 = vadd.f32 %v682_v27, %v537_v26 }
  0xcb   : > { %v915_v28 = vadd.f32 %v1886_v52, %v895_v25 }
  0xcd   : > { %v931_v29 = vmax.f32 %v915_v28, 0.0 }
  0xce   : > { %v1933_v32 = vpop.f32.mrf.mxu3 }
  0xcf   : > { %v995_v30 = vmax.f32 %v979_v60, %v931_v29 }
  0xd0   : > { %v860_v33 = vpop.f32.mrf.mxu2  ;;  %v540_v35 = vpop.f32.mrf.mxu0 }
  0xd1   : > { %v896_v34 = vadd.f32 %v860_v33, %v683_v31  ;;  %1011 = vst [vmem:[%s1911_s9 + $0x10] sm:$0xff] %v995_v30  ;;  %v685_v36 = vpop.f32.mrf.mxu1 }
  0xd2   : > { %v686_v39 = vadd.f32 %v685_v36, %v540_v35 }
  0xd3   : > { %v916_v37 = vadd.f32 %v1886_v52, %v896_v34 }
  0xd5   : > { %v932_v38 = vmax.f32 %v916_v37, 0.0 }
  0xd6   : > { %v705_v42 = vpop.f32.mrf.mxu3 }
  0xd7   : > { %v1474_v40 = vpack.c.bf16 %v932_v38, %v931_v29  ;;  %v996_v41 = vmax.f32 %v980_v61, %v932_v38  ;;  %v706_v28 = vadd.f32 %v705_v42, %v1881_v51 }
  0xd8   : > { %v863_v43 = vpop.f32.mrf.mxu2  ;;  %v542_v45 = vpop.f32.mrf.mxu0 }
  0xd9   : > { %1506 = vst [vmem:[%s1928_s16 + $0x8] sm:$0xff] %v1474_v40   ;;  %v897_v44 = vadd.f32 %v863_v43, %v686_v39  ;;  %v687_v46 = vpop.f32.mrf.mxu1 }
  0xda   : > { %1012 = vst [vmem:[%s1911_s9 + $0x18] sm:$0xff] %v996_v41  ;;  %v688_v50 = vadd.f32 %v687_v46, %v542_v45 }
  0xdb   : > { %v917_v47 = vadd.f32 %v1886_v52, %v897_v44 }
  0xdd   : > { %v933_v48 = vmax.f32 %v917_v47, 0.0 }
  0xde   : > { %v707_v53 = vpop.f32.mrf.mxu3 }
  0xdf   : > { %v997_v49 = vmax.f32 %v981_v62, %v933_v48  ;;  %v708_v51 = vadd.f32 %v707_v53, %v1919_v13 }
  0xe0   : > { %v865_v54 = vpop.f32.mrf.mxu2  ;;  %v545_v56 = vpop.f32.mrf.mxu0 }
  0xe1   : > { %v898_v55 = vadd.f32 %v865_v54, %v688_v50  ;;  %1013 = vst [vmem:[%s1911_s9 + $0x20] sm:$0xff] %v997_v49  ;;  %v690_v57 = vpop.f32.mrf.mxu1 }
  0xe2   : > { %v691_v60 = vadd.f32 %v690_v57, %v545_v56 }
  0xe3   : > { %v918_v58 = vadd.f32 %v1886_v52, %v898_v55 }
  0xe5   : > { %v934_v59 = vmax.f32 %v918_v58, 0.0 }
  0xe6   : > { %v710_v11 = vpop.f32.mrf.mxu3 }
  0xe7   : > { %v1479_v61 = vpack.c.bf16 %v934_v59, %v933_v48  ;;  %v998_v4 = vmax.f32 %v1892_v63, %v934_v59  ;;  %v711_v53 = vadd.f32 %v710_v11, %v1926_v23 }
  0xe8   : > { %v868_v12 = vpop.f32.mrf.mxu2  ;;  %v547_v14 = vpop.f32.mrf.mxu0 }
  0xe9   : > { %1507 = vst [vmem:[%s1928_s16 + $0x10] sm:$0xff] %v1479_v61   ;;  %v899_v62 = vadd.f32 %v868_v12, %v691_v60  ;;  %v692_v15 = vpop.f32.mrf.mxu1 }
  0xea   : > { %1014 = vst [vmem:[%s1911_s9 + $0x28] sm:$0xff] %v998_v4  ;;  %v693_v19 = vadd.f32 %v692_v15, %v547_v14 }
  0xeb   : > { %v919_v16 = vadd.f32 %v1886_v52, %v899_v62 }
  0xed   : > { %v935_v17 = vmax.f32 %v919_v16, 0.0 }
  0xee   : > { %v712_v20 = vpop.f32.mrf.mxu3 }
  0xef   : > { %v999_v18 = vmax.f32 %v1894_v0, %v935_v17 }
  0xf0   : > { %v870_v21 = vpop.f32.mrf.mxu2  ;;  %v550_v24 = vpop.f32.mrf.mxu0 }
  0xf1   : > { %v900_v22 = vadd.f32 %v870_v21, %v693_v19  ;;  %1015 = vst [vmem:[%s1911_s9 + $0x30] sm:$0xff] %v999_v18  ;;  %v695_v63 = vpop.f32.mrf.mxu1 }
  0xf2   : > { %v696_v27 = vadd.f32 %v695_v63, %v550_v24 }
  0xf3   : > { %v920_v25 = vadd.f32 %v1886_v52, %v900_v22 }
  0xf5   : > { %v936_v26 = vmax.f32 %v920_v25, 0.0 }
  0xf6   : > { %v883_v31 = vpop.f32.mrf.mxu3 }
  0xf7   : > { %v1484_v29 = vpack.c.bf16 %v936_v26, %v935_v17  ;;  %v1000_v30 = vmax.f32 %v1896_v1, %v936_v26  ;;  %v905_v33 = vadd.f32 %v883_v31, %v706_v28 }
  0xf8   : > { %v873_v0 = vpop.f32.mrf.mxu2  ;;  %v552_v35 = vpop.f32.mrf.mxu0 }
  0xf9   : > { %1508 = vst [vmem:[%s1928_s16 + $0x18] sm:$0xff] %v1484_v29   ;;  %v901_v34 = vadd.f32 %v873_v0, %v696_v27  ;;  %v925_v36 = vadd.f32 %v1886_v52, %v905_v33  ;;  %v697_v37 = vpop.f32.mrf.mxu1 }
  0xfa   : > { %1016 = vst [vmem:[%s1911_s9 + $0x38] sm:$0xff] %v1000_v30  ;;  %v698_v42 = vadd.f32 %v697_v37, %v552_v35 }
  0xfb   : > { %v921_v38 = vadd.f32 %v1886_v52, %v901_v34  ;;  %v941_v39 = vmax.f32 %v925_v36, 0.0 }
  0xfd   : > { %v937_v40 = vmax.f32 %v921_v38, 0.0  ;;  %v1005_v1 = vmax.f32 %v1900_v3, %v941_v39 }
  0xfe   : > { %v885_v43 = vpop.f32.mrf.mxu3 }
  0xff   : > { %v1001_v41 = vmax.f32 %v1898_v2, %v937_v40  ;;  %v906_v45 = vadd.f32 %v885_v43, %v708_v51  ;;  %1021 = vst [vmem:[%s1911_s9 + $0x60] sm:$0xff] %v1005_v1 }
 0x100   : > { %v875_v44 = vpop.f32.mrf.mxu2  ;;  %v555_v48 = vpop.f32.mrf.mxu0 }
 0x101   : > { %v902_v46 = vadd.f32 %v875_v44, %v698_v42  ;;  %1017 = vst [vmem:[%s1911_s9 + $0x40] sm:$0xff] %v1001_v41  ;;  %v926_v47 = vadd.f32 %v1886_v52, %v906_v45  ;;  %v700_v49 = vpop.f32.mrf.mxu1 }
 0x102   : > { %v701_v2 = vadd.f32 %v700_v49, %v555_v48 }
 0x103   : > { %v922_v50 = vadd.f32 %v1886_v52, %v902_v46  ;;  %v942_v13 = vmax.f32 %v926_v47, 0.0 }
 0x105   : > { %v938_v3 = vmax.f32 %v922_v50, 0.0  ;;  %v1499_v54 = vpack.c.bf16 %v942_v13, %v941_v39  ;;  %v1006_v57 = vmax.f32 %v1904_v6, %v942_v13  ;;  %v713_v6 = vadd.f32 %v712_v20, %v1933_v32 }
 0x106   : > { %v888_v58 = vpop.f32.mrf.mxu3 }
 0x107   : > { %v1489_v55 = vpack.c.bf16 %v938_v3, %v937_v40  ;;  %v1002_v56 = vmax.f32 %v1902_v5, %v938_v3  ;;  %1511 = vst [vmem:[%s1928_s16 + $0x30] sm:$0xff] %v1499_v54   ;;  %v907_v60 = vadd.f32 %v888_v58, %v711_v53 }
 0x108   : > { %v878_v59 = vpop.f32.mrf.mxu2  ;;  %1022 = vst [vmem:[%s1911_s9 + $0x68] sm:$0xff] %v1006_v57  ;;  %v557_v11 = vpop.f32.mrf.mxu0 }
 0x109   : > { %1509 = vst [vmem:[%s1928_s16 + $0x20] sm:$0xff] %v1489_v55   ;;  %v903_v61 = vadd.f32 %v878_v59, %v701_v2  ;;  %v927_v4 = vadd.f32 %v1886_v52, %v907_v60  ;;  %v702_v5 = vpop.f32.mrf.mxu1 }
 0x10a   : > { %1018 = vst [vmem:[%s1911_s9 + $0x48] sm:$0xff] %v1002_v56  ;;  %v703_v16 = vadd.f32 %v702_v5, %v557_v11 }
 0x10b   : > { %v923_v12 = vadd.f32 %v1886_v52, %v903_v61  ;;  %v943_v23 = vmax.f32 %v927_v4, 0.0 }
 0x10d   : > { %v939_v62 = vmax.f32 %v923_v12, 0.0  ;;  %v1007_v14 = vmax.f32 %v1913_v8, %v943_v23 }
 0x10e   : > { %v890_v17 = vpop.f32.mrf.mxu3 }
 0x10f   : > { %v1003_v15 = vmax.f32 %v1906_v7, %v939_v62  ;;  %v908_v19 = vadd.f32 %v890_v17, %v713_v6  ;;  %1023 = vst [vmem:[%s1911_s9 + $0x70] sm:$0xff] %v1007_v14 }
 0x110   : > { %v880_v18 = vpop.f32.mrf.mxu2 }
 0x111   : > { %v904_v21 = vadd.f32 %v880_v18, %v703_v16  ;;  %1019 = vst [vmem:[%s1911_s9 + $0x50] sm:$0xff] %v1003_v15  ;;  %v928_v22 = vadd.f32 %v1886_v52, %v908_v19 }
 0x113   : > { %v924_v7 = vadd.f32 %v1886_v52, %v904_v21  ;;  %v944_v8 = vmax.f32 %v928_v22, 0.0 }
 0x115   : > { %v940_v32 = vmax.f32 %v924_v7, 0.0  ;;  %v1504_v20 = vpack.c.bf16 %v944_v8, %v943_v23  ;;  %v1008_v25 = vmax.f32 %v1917_v10, %v944_v8 }
 0x117   : > { %v1494_v24 = vpack.c.bf16 %v940_v32, %v939_v62  ;;  %v1004_v63 = vmax.f32 %v1915_v9, %v940_v32  ;;  %1512 = vst [vmem:[%s1928_s16 + $0x38] sm:$0xff] %v1504_v20  }
 0x118   : > { %1024 = vst [vmem:[%s1911_s9 + $0x78] sm:$0xff] %v1008_v25 }
 0x119   : > { %1510 = vst [vmem:[%s1928_s16 + $0x28] sm:$0xff] %v1494_v24  }
 0x11a   : > { %1020 = vst [vmem:[%s1911_s9 + $0x58] sm:$0xff] %v1004_v63 }
 0x11b   : > { %1606 = shalt.err (!%p1603_p3)
}
 0x11c   : > { %s1643_s9 = smov 64   ;;  %s1644_s13 = smov 4  }
 0x11d   : > { %1537 = dma.vmem_to_hbm [thread:$0]  (%p1723_p5), %s1044_s28, 1024, %s1046_s21, %s1026_s22, %s1643_s9, %s1643_s9, %s1644_s13  }
 0x11e PF: > { %p1543_p4 = scmp.ge.s32.totalorder %s1641_s27, 2  ;;  %s1064_s16 = sand.u32 1, %s1629_s24  }
 0x11f   : > { %s1065_s15 = scalar_lea.sflag [#allocation3], %s1064_s16 }
 0x120   : > { %p1540_p7 = pnand %p1543_p4, %p1727_p6 }
 0x122   : > { %p1541_p8 = pneg %p1540_p7 }
 0x124   : > { %1624 = dma.done.wait (%p1541_p8), %s1065_s15, 1024  }
 0x125   : > { %1626 = vsyncadd (%p1541_p8), %s1065_s15, 4294966272  ;;  %p18_p9 = scmp.ge.s32.totalorder %s1710_s30, 4   ;;  %s2028_s24 = smov %s1633_s25 }
 0x126   : > { %s2029_s25 = smov %s1637_s26  ;;  %s2030_s26 = smov %s1721_s10 }
 0x127   : > { %s2031_s27 = smov %s1710_s30  ;;  %20 = sbr.rel (!%p18_p9) target bundleno = 3 (0x3), region = 102 }
 0x12c   :  { %1079 = vsyncpa [#allocation3], 1 }
 0x12d   :  { %1081 = vsyncpa [#allocation3 + $0x1], 1 }

// kernel: dea_gnn_jk_forward.12
= control target key start
LH: loop header
LB: loop body
LE: loop exit
PB: predicated region body
PF: predicated region fallthrough
CT: control target
= control target key end

     0   :  { %s1572_s24 = smov 0   ;;  %s1839_s0 = inlined_call_operand.vmem [shape: bf16[256,128], index: 0, kind: input, shape index: {}]   ;;  %s1840_s1 = inlined_call_operand.vmem [shape: bf16[256,128], index: 1, kind: input, shape index: {}]   ;;  %s1841_s2 = inlined_call_operand.vmem [shape: bf16[256,128], index: 2, kind: input, shape index: {}]   ;;  %s1842_s3 = inlined_call_operand.vmem [shape: bf16[3,128,128], index: 3, kind: input, shape index: {}]   ;;  %s1843_s4 = inlined_call_operand.vmem [shape: f32[1,128], index: 4, kind: input, shape index: {}]   ;;  %s1844_s5 = inlined_call_operand.vmem [shape: f32[256,128], index: 5, kind: input, shape index: {}, may-alias: {5,7}]   ;;  %s1845_s6 = inlined_call_operand.vmem [shape: bf16[256,128], index: 6, kind: output, shape index: {0}]   ;;  %s1846_s7 = inlined_call_operand.vmem [shape: f32[256,128], index: 7, kind: output, shape index: {1}, may-alias: {5,7}]  }
   0x1 LB: > { %s1153_s25 = sadd.s32 4294967295, %s1530_s24   ;;  %p1157_p0 = scmp.ge.s32.totalorder %s1530_s24, 1  ;;  %s1530_s24 = sphi %s1572_s24, %s18_s24  }
   0x2   : > { %p274_p1 = scmp.lt.s32.totalorder %s1530_s24, 3 }
   0x4   : > { %p275_p2 = pnand %p1157_p0, %p274_p1 }
   0x5   : > { %s1158_s29 = sshll.u32 (!%p275_p2), %s1153_s25, 4 }
   0x6   : > { %278 = sbr.rel (%p275_p2) target bundleno = 275 (0x113), region = 44  ;;  %p327_p3 = scmp.lt.s32.totalorder (!%p275_p2), %s1158_s29, 31 }
   0xb   : > { %v1427_v0 = vld [vmem:[%s1842_s3 + $0x78] sm:$0xff]  ;;  %v1426_v3 = vld [vmem:[%s1842_s3 + $0x70] sm:$0xff]  ;;  %v1425_v6 = vld [vmem:[%s1842_s3 + $0x68] sm:$0xff]  ;;  %s1848_s29 = smov (!%p327_p3, %s1158_s29), 31 }
   0xc   : > { %v1586_v1 = vld [vmem:[%s1842_s3 + $0x38] sm:$0xff]  ;;  %523 = vmatpush.bf16.msra.mxu0 %v1427_v0  ;;  %1491 = vmatpush.bf16.msra.mxu3 %v1427_v0  ;;  %v1601_v4 = vld [vmem:[%s1842_s3 + $0x30] sm:$0xff]  ;;  %v1409_v7 = vld [vmem:[%s1842_s3 + $0x28] sm:$0xff]  ;;  %s1670_s26 = sshll.u32 %s1848_s29, 2  ;;  %s1165_s19 = sshll.u32 %s1848_s29, 3 }
   0xd   : > { %v1591_v2 = vld [vmem:[%s1842_s3 + $0xb8] sm:$0xff]  ;;  %668 = vmatpush.bf16.msra.mxu1 %v1586_v1  ;;  %v1606_v5 = vld [vmem:[%s1842_s3 + $0xb0] sm:$0xff]  ;;  %v1619_v8 = vld [vmem:[%s1842_s3 + $0xa8] sm:$0xff]  ;;  %s1679_s9 = scalar_lea.vmem %s1840_s1, %s1670_s26  ;;  %s1691_s15 = scalar_lea.vmem %s1839_s0, %s1670_s26 }
   0xe   : > { %846 = vmatpush.bf16.msra.mxu2 %v1591_v2  ;;  %v1424_v9 = vld [vmem:[%s1842_s3 + $0x60] sm:$0xff]  ;;  %v1423_v12 = vld [vmem:[%s1842_s3 + $0x58] sm:$0xff]  ;;  %v1422_v15 = vld [vmem:[%s1842_s3 + $0x50] sm:$0xff]  ;;  %s1697_s18 = scalar_lea.vmem %s1841_s2, %s1670_s26  ;;  %s348_s27 = scalar_lea.vmem %s1844_s5, %s1165_s19 }
   0xf   : > { %v1408_v10 = vld [vmem:[%s1842_s3 + $0x20] sm:$0xff]  ;;  %v1407_v13 = vld [vmem:[%s1842_s3 + $0x18] sm:$0xff]  ;;  %v1406_v16 = vld [vmem:[%s1842_s3 + $0x10] sm:$0xff]  ;;  %s1762_s30 = scalar_lea.vmem %s1846_s7, %s1165_s19  ;;  %s1778_s10 = scalar_lea.vmem %s1845_s6, %s1670_s26 }
  0x10   : > { %524 = vmatpush.bf16.msra.mxu0 %v1426_v3  ;;  %1492 = vmatpush.bf16.msra.mxu3 %v1426_v3  ;;  %v1631_v11 = vld [vmem:[%s1842_s3 + $0xa0] sm:$0xff]  ;;  %v1643_v14 = vld [vmem:[%s1842_s3 + $0x98] sm:$0xff]  ;;  %v1655_v17 = vld [vmem:[%s1842_s3 + $0x90] sm:$0xff] }
  0x11   : > { %669 = vmatpush.bf16.msra.mxu1 %v1601_v4  ;;  %v1421_v18 = vld [vmem:[%s1842_s3 + $0x48] sm:$0xff]  ;;  %v1420_v21 = vld [vmem:[%s1842_s3 + $0x40] sm:$0xff]  ;;  %v1418_v25 = vld [vmem:[%s1679_s9 + $0x30] sm:$0xff] }
  0x12   : > { %847 = vmatpush.bf16.msra.mxu2 %v1606_v5  ;;  %v1405_v19 = vld [vmem:[%s1842_s3 + $0x8] sm:$0xff]  ;;  %v1404_v22 = vld [vmem:[%s1842_s3] sm:$0xff]  ;;  %v1419_v29 = vld [vmem:[%s1679_s9 + $0x38] sm:$0xff] }
  0x13   : > { %v1437_v20 = vld [vmem:[%s1842_s3 + $0x88] sm:$0xff]  ;;  %v1436_v23 = vld [vmem:[%s1842_s3 + $0x80] sm:$0xff]  ;;  %v1414_v32 = vld [vmem:[%s1679_s9 + $0x10] sm:$0xff] }
  0x14   : > { %525 = vmatpush.bf16.msra.mxu0 %v1425_v6  ;;  %1493 = vmatpush.bf16.msra.mxu3 %v1425_v6  ;;  %v1412_v24 = vld [vmem:[%s1679_s9] sm:$0xff]  ;;  %v1413_v28 = vld [vmem:[%s1679_s9 + $0x8] sm:$0xff]  ;;  %v1402_v33 = vld [vmem:[%s1691_s15 + $0x30] sm:$0xff] }
  0x15   : > { %670 = vmatpush.bf16.msra.mxu1 %v1409_v7  ;;  %v1396_v26 = vld [vmem:[%s1691_s15] sm:$0xff]  ;;  %v1397_v30 = vld [vmem:[%s1691_s15 + $0x8] sm:$0xff]  ;;  %v1398_v34 = vld [vmem:[%s1691_s15 + $0x10] sm:$0xff] }
  0x16   : > { %848 = vmatpush.bf16.msra.mxu2 %v1619_v8  ;;  %v1428_v27 = vld [vmem:[%s1697_s18] sm:$0xff]  ;;  %v1429_v31 = vld [vmem:[%s1697_s18 + $0x8] sm:$0xff]  ;;  %v1430_v35 = vld [vmem:[%s1697_s18 + $0x10] sm:$0xff] }
  0x17   : > { %v1415_v36 = vld [vmem:[%s1679_s9 + $0x18] sm:$0xff]  ;;  %v1416_v40 = vld [vmem:[%s1679_s9 + $0x20] sm:$0xff]  ;;  %v1434_v41 = vld [vmem:[%s1697_s18 + $0x30] sm:$0xff] }
  0x18   : > { %526 = vmatpush.bf16.msra.mxu0 %v1424_v9  ;;  %1494 = vmatpush.bf16.msra.mxu3 %v1424_v9  ;;  %v1403_v37 = vld [vmem:[%s1691_s15 + $0x38] sm:$0xff]  ;;  %v1400_v42 = vld [vmem:[%s1691_s15 + $0x20] sm:$0xff]  ;;  %v1417_v44 = vld [vmem:[%s1679_s9 + $0x28] sm:$0xff] }
  0x19   : > { %671 = vmatpush.bf16.msra.mxu1 %v1408_v10  ;;  %v1399_v38 = vld [vmem:[%s1691_s15 + $0x18] sm:$0xff]  ;;  %v1432_v43 = vld [vmem:[%s1697_s18 + $0x20] sm:$0xff]  ;;  %v1401_v46 = vld [vmem:[%s1691_s15 + $0x28] sm:$0xff] }
  0x1a   : > { %849 = vmatpush.bf16.msra.mxu2 %v1631_v11  ;;  %v1431_v39 = vld [vmem:[%s1697_s18 + $0x18] sm:$0xff]  ;;  %v1433_v47 = vld [vmem:[%s1697_s18 + $0x28] sm:$0xff]  ;;  %v1737_v52 = vld [vmem:[%s1843_s4] ss:$0 sm:$0xff] }
  0x1b   : > { %v1435_v45 = vld [vmem:[%s1697_s18 + $0x38] sm:$0xff]  ;;  %v979_v58 = vld [vmem:[%s348_s27] sm:$0xff]  ;;  %v980_v59 = vld [vmem:[%s348_s27 + $0x8] sm:$0xff] }
  0x1c   : > { %527 = vmatpush.bf16.msra.mxu0 %v1423_v12  ;;  %1495 = vmatpush.bf16.msra.mxu3 %v1423_v12  ;;  %v981_v60 = vld [vmem:[%s348_s27 + $0x10] sm:$0xff]  ;;  %v982_v61 = vld [vmem:[%s348_s27 + $0x18] sm:$0xff]  ;;  %v983_v62 = vld [vmem:[%s348_s27 + $0x20] sm:$0xff] }
  0x1d   : > { %672 = vmatpush.bf16.msra.mxu1 %v1407_v13  ;;  %v1743_v63 = vld [vmem:[%s348_s27 + $0x28] sm:$0xff]  ;;  %v1745_v0 = vld [vmem:[%s348_s27 + $0x30] sm:$0xff]  ;;  %v1751_v3 = vld [vmem:[%s348_s27 + $0x60] sm:$0xff] }
  0x1e   : > { %850 = vmatpush.bf16.msra.mxu2 %v1643_v14  ;;  %v1755_v6 = vld [vmem:[%s348_s27 + $0x68] sm:$0xff]  ;;  %v1766_v9 = vld [vmem:[%s348_s27 + $0x58] sm:$0xff] }
  0x20   : > { %528 = vmatpush.bf16.msra.mxu0 %v1422_v15  ;;  %1496 = vmatpush.bf16.msra.mxu3 %v1422_v15 }
  0x21   : > { %673 = vmatpush.bf16.msra.mxu1 %v1406_v16 }
  0x22   : > { %851 = vmatpush.bf16.msra.mxu2 %v1655_v17 }
  0x24   : > { %529 = vmatpush.bf16.msra.mxu0 %v1421_v18  ;;  %1497 = vmatpush.bf16.msra.mxu3 %v1421_v18 }
  0x25   : > { %674 = vmatpush.bf16.msra.mxu1 %v1405_v19 }
  0x26   : > { %852 = vmatpush.bf16.msra.mxu2 %v1437_v20 }
  0x28   : > { %530 = vmatpush.bf16.msra.mxu0 %v1420_v21  ;;  %1498 = vmatpush.bf16.msra.mxu3 %v1420_v21 }
  0x29   : > { %675 = vmatpush.bf16.msra.mxu1 %v1404_v22 }
  0x2a   : > { %853 = vmatpush.bf16.msra.mxu2 %v1436_v23 }
  0x2b   : > { %531 = vmatmul.bf16.vlgmr.msra.gmra.mxu0 %v1412_v24  ;;  %561 = vmatmul.bf16.vlgmr.msra.gmra.mxu3 %v1418_v25 }
  0x2c   : > { %1499 = vmatpush.bf16.msrb.mxu3 %v1586_v1  ;;  %676 = vmatmul.bf16.vlgmr.msra.gmra.mxu1 %v1396_v26  ;;  %v1747_v1 = vld [vmem:[%s348_s27 + $0x38] sm:$0xff] }
  0x2d   : > { %854 = vmatmul.bf16.vlgmr.msra.gmra.mxu2 %v1428_v27 }
  0x30   : > { %1500 = vmatpush.bf16.msrb.mxu3 %v1601_v4 }
  0x34   : > { %1501 = vmatpush.bf16.msrb.mxu3 %v1409_v7  ;;  %v1757_v7 = vld [vmem:[%s348_s27 + $0x50] sm:$0xff] }
  0x38   : > { %1502 = vmatpush.bf16.msrb.mxu3 %v1408_v10  ;;  %v1768_v10 = vld [vmem:[%s348_s27 + $0x78] sm:$0xff] }
  0x3b   : > { %536 = vmatmul.bf16.gmra.mxu0 %v1413_v28  ;;  %566 = vmatmul.bf16.gmra.mxu3 %v1419_v29 }
  0x3c   : > { %1503 = vmatpush.bf16.msrb.mxu3 %v1407_v13  ;;  %681 = vmatmul.bf16.gmra.mxu1 %v1397_v30 }
  0x3d   : > { %859 = vmatmul.bf16.gmra.mxu2 %v1429_v31 }
  0x40   : > { %1504 = vmatpush.bf16.msrb.mxu3 %v1406_v16 }
  0x44   : > { %1505 = vmatpush.bf16.msrb.mxu3 %v1405_v19 }
  0x48   : > { %1506 = vmatpush.bf16.msrb.mxu3 %v1404_v22 }
  0x4b   : > { %541 = vmatmul.bf16.gmra.mxu0 %v1414_v32  ;;  %706 = vmatmul.bf16.vlgmr.msrb.gmra.mxu3 %v1402_v33 }
  0x4c   : > { %1507 = vmatpush.bf16.msra.mxu3 %v1591_v2  ;;  %686 = vmatmul.bf16.gmra.mxu1 %v1398_v34  ;;  %v1749_v2 = vld [vmem:[%s348_s27 + $0x40] sm:$0xff] }
  0x4d   : > { %864 = vmatmul.bf16.gmra.mxu2 %v1430_v35 }
  0x50   : > { %1508 = vmatpush.bf16.msra.mxu3 %v1606_v5  ;;  %v1753_v5 = vld [vmem:[%s348_s27 + $0x48] sm:$0xff] }
  0x54   : > { %1509 = vmatpush.bf16.msra.mxu3 %v1619_v8  ;;  %v1764_v8 = vld [vmem:[%s348_s27 + $0x70] sm:$0xff] }
  0x58   : > { %1510 = vmatpush.bf16.msra.mxu3 %v1631_v11 }
  0x5b   : > { %546 = vmatmul.bf16.gmra.mxu0 %v1415_v36  ;;  %711 = vmatmul.bf16.gmra.mxu3 %v1403_v37 }
  0x5c   : > { %1511 = vmatpush.bf16.msra.mxu3 %v1643_v14  ;;  %691 = vmatmul.bf16.gmra.mxu1 %v1399_v38 }
  0x5d   : > { %869 = vmatmul.bf16.gmra.mxu2 %v1431_v39 }
  0x60   : > { %1512 = vmatpush.bf16.msra.mxu3 %v1655_v17 }
  0x64   : > { %1513 = vmatpush.bf16.msra.mxu3 %v1437_v20 }
  0x68   : > { %1514 = vmatpush.bf16.msra.mxu3 %v1436_v23 }
  0x6b   : > { %551 = vmatmul.bf16.gmra.mxu0 %v1416_v40  ;;  %884 = vmatmul.bf16.vlgmr.msra.gmra.mxu3 %v1434_v41 }
  0x6c   : > { %696 = vmatmul.bf16.gmra.mxu1 %v1400_v42 }
  0x6d   : > { %874 = vmatmul.bf16.gmra.mxu2 %v1432_v43 }
  0x7b   : > { %556 = vmatmul.bf16.gmra.mxu0 %v1417_v44  ;;  %889 = vmatmul.bf16.gmra.mxu3 %v1435_v45 }
  0x7c   : > { %701 = vmatmul.bf16.gmra.mxu1 %v1401_v46 }
  0x7d   : > { %879 = vmatmul.bf16.gmra.mxu2 %v1433_v47 }
  0xa8   : > { %v532_v48 = vpop.f32.mrf.mxu0 }
  0xa9   : > { %v677_v49 = vpop.f32.mrf.mxu1 }
  0xaa   : > { %v678_v50 = vadd.f32 %v677_v49, %v532_v48 }
  0xae   : > { %v1732_v51 = vpop.f32.mrf.mxu3 }
  0xb0   : > { %v855_v53 = vpop.f32.mrf.mxu2  ;;  %v534_v55 = vpop.f32.mrf.mxu0 }
  0xb1   : > { %v895_v54 = vadd.f32 %v855_v53, %v678_v50  ;;  %v679_v56 = vpop.f32.mrf.mxu1 }
  0xb2   : > { %v680_v12 = vadd.f32 %v679_v56, %v534_v55 }
  0xb3   : > { %v915_v57 = vadd.f32 %v1737_v52, %v895_v54 }
  0xb5   : > { %v931_v4 = vmax.f32 %v915_v57, 0.0 }
  0xb6   : > { %v1770_v13 = vpop.f32.mrf.mxu3 }
  0xb7   : > { %v995_v11 = vmax.f32 %v979_v58, %v931_v4 }
  0xb8   : > { %v857_v14 = vpop.f32.mrf.mxu2  ;;  %v537_v16 = vpop.f32.mrf.mxu0 }
  0xb9   : > { %v896_v15 = vadd.f32 %v857_v14, %v680_v12  ;;  %1011 = vst [vmem:[%s1762_s30] sm:$0xff] %v995_v11  ;;  %v682_v17 = vpop.f32.mrf.mxu1 }
  0xba   : > { %v683_v20 = vadd.f32 %v682_v17, %v537_v16 }
  0xbb   : > { %v916_v18 = vadd.f32 %v1737_v52, %v896_v15 }
  0xbd   : > { %v932_v19 = vmax.f32 %v916_v18, 0.0 }
  0xbe   : > { %v1780_v23 = vpop.f32.mrf.mxu3 }
  0xbf   : > { %v1447_v21 = vpack.c.bf16 %v932_v19, %v931_v4  ;;  %v996_v22 = vmax.f32 %v980_v59, %v932_v19 }
  0xc0   : > { %v860_v24 = vpop.f32.mrf.mxu2  ;;  %v539_v26 = vpop.f32.mrf.mxu0 }
  0xc1   : > { %1448 = vst [vmem:[%s1778_s10] sm:$0xff] %v1447_v21   ;;  %v897_v25 = vadd.f32 %v860_v24, %v683_v20  ;;  %v684_v27 = vpop.f32.mrf.mxu1 }
  0xc2   : > { %1012 = vst [vmem:[%s1762_s30 + $0x8] sm:$0xff] %v996_v22  ;;  %v685_v31 = vadd.f32 %v684_v27, %v539_v26 }
  0xc3   : > { %v917_v28 = vadd.f32 %v1737_v52, %v897_v25 }
  0xc5   : > { %v933_v29 = vmax.f32 %v917_v28, 0.0 }
  0xc6   : > { %v1785_v32 = vpop.f32.mrf.mxu3 }
  0xc7   : > { %v997_v30 = vmax.f32 %v981_v60, %v933_v29 }
  0xc8   : > { %v862_v33 = vpop.f32.mrf.mxu2  ;;  %v542_v35 = vpop.f32.mrf.mxu0 }
  0xc9   : > { %v898_v34 = vadd.f32 %v862_v33, %v685_v31  ;;  %1013 = vst [vmem:[%s1762_s30 + $0x10] sm:$0xff] %v997_v30  ;;  %v687_v36 = vpop.f32.mrf.mxu1 }
  0xca   : > { %v688_v39 = vadd.f32 %v687_v36, %v542_v35 }
  0xcb   : > { %v918_v37 = vadd.f32 %v1737_v52, %v898_v34 }
  0xcd   : > { %v934_v38 = vmax.f32 %v918_v37, 0.0 }
  0xce   : > { %v707_v42 = vpop.f32.mrf.mxu3 }
  0xcf   : > { %v1452_v40 = vpack.c.bf16 %v934_v38, %v933_v29  ;;  %v998_v41 = vmax.f32 %v982_v61, %v934_v38  ;;  %v708_v28 = vadd.f32 %v707_v42, %v1732_v51 }
  0xd0   : > { %v865_v43 = vpop.f32.mrf.mxu2  ;;  %v544_v45 = vpop.f32.mrf.mxu0 }
  0xd1   : > { %1484 = vst [vmem:[%s1778_s10 + $0x8] sm:$0xff] %v1452_v40   ;;  %v899_v44 = vadd.f32 %v865_v43, %v688_v39  ;;  %v689_v46 = vpop.f32.mrf.mxu1 }
  0xd2   : > { %1014 = vst [vmem:[%s1762_s30 + $0x18] sm:$0xff] %v998_v41  ;;  %v690_v50 = vadd.f32 %v689_v46, %v544_v45 }
  0xd3   : > { %v919_v47 = vadd.f32 %v1737_v52, %v899_v44 }
  0xd5   : > { %v935_v48 = vmax.f32 %v919_v47, 0.0 }
  0xd6   : > { %v709_v53 = vpop.f32.mrf.mxu3 }
  0xd7   : > { %v999_v49 = vmax.f32 %v983_v62, %v935_v48  ;;  %v710_v51 = vadd.f32 %v709_v53, %v1770_v13 }
  0xd8   : > { %v867_v54 = vpop.f32.mrf.mxu2  ;;  %v547_v56 = vpop.f32.mrf.mxu0 }
  0xd9   : > { %v900_v55 = vadd.f32 %v867_v54, %v690_v50  ;;  %1015 = vst [vmem:[%s1762_s30 + $0x20] sm:$0xff] %v999_v49  ;;  %v692_v57 = vpop.f32.mrf.mxu1 }
  0xda   : > { %v693_v60 = vadd.f32 %v692_v57, %v547_v56 }
  0xdb   : > { %v920_v58 = vadd.f32 %v1737_v52, %v900_v55 }
  0xdd   : > { %v936_v59 = vmax.f32 %v920_v58, 0.0 }
  0xde   : > { %v712_v11 = vpop.f32.mrf.mxu3 }
  0xdf   : > { %v1457_v61 = vpack.c.bf16 %v936_v59, %v935_v48  ;;  %v1000_v4 = vmax.f32 %v1743_v63, %v936_v59  ;;  %v713_v53 = vadd.f32 %v712_v11, %v1780_v23 }
  0xe0   : > { %v870_v12 = vpop.f32.mrf.mxu2  ;;  %v549_v14 = vpop.f32.mrf.mxu0 }
  0xe1   : > { %1485 = vst [vmem:[%s1778_s10 + $0x10] sm:$0xff] %v1457_v61   ;;  %v901_v62 = vadd.f32 %v870_v12, %v693_v60  ;;  %v694_v15 = vpop.f32.mrf.mxu1 }
  0xe2   : > { %1016 = vst [vmem:[%s1762_s30 + $0x28] sm:$0xff] %v1000_v4  ;;  %v695_v19 = vadd.f32 %v694_v15, %v549_v14 }
  0xe3   : > { %v921_v16 = vadd.f32 %v1737_v52, %v901_v62 }
  0xe5   : > { %v937_v17 = vmax.f32 %v921_v16, 0.0 }
  0xe6   : > { %v714_v20 = vpop.f32.mrf.mxu3 }
  0xe7   : > { %v1001_v18 = vmax.f32 %v1745_v0, %v937_v17 }
  0xe8   : > { %v872_v21 = vpop.f32.mrf.mxu2  ;;  %v552_v24 = vpop.f32.mrf.mxu0 }
  0xe9   : > { %v902_v22 = vadd.f32 %v872_v21, %v695_v19  ;;  %1017 = vst [vmem:[%s1762_s30 + $0x30] sm:$0xff] %v1001_v18  ;;  %v697_v63 = vpop.f32.mrf.mxu1 }
  0xea   : > { %v698_v27 = vadd.f32 %v697_v63, %v552_v24 }
  0xeb   : > { %v922_v25 = vadd.f32 %v1737_v52, %v902_v22 }
  0xed   : > { %v938_v26 = vmax.f32 %v922_v25, 0.0 }
  0xee   : > { %v885_v31 = vpop.f32.mrf.mxu3 }
  0xef   : > { %v1462_v29 = vpack.c.bf16 %v938_v26, %v937_v17  ;;  %v1002_v30 = vmax.f32 %v1747_v1, %v938_v26  ;;  %v907_v33 = vadd.f32 %v885_v31, %v708_v28 }
  0xf0   : > { %v875_v0 = vpop.f32.mrf.mxu2  ;;  %v554_v35 = vpop.f32.mrf.mxu0 }
  0xf1   : > { %1486 = vst [vmem:[%s1778_s10 + $0x18] sm:$0xff] %v1462_v29   ;;  %v903_v34 = vadd.f32 %v875_v0, %v698_v27  ;;  %v927_v36 = vadd.f32 %v1737_v52, %v907_v33  ;;  %v699_v37 = vpop.f32.mrf.mxu1 }
  0xf2   : > { %1018 = vst [vmem:[%s1762_s30 + $0x38] sm:$0xff] %v1002_v30  ;;  %v700_v42 = vadd.f32 %v699_v37, %v554_v35 }
  0xf3   : > { %v923_v38 = vadd.f32 %v1737_v52, %v903_v34  ;;  %v943_v39 = vmax.f32 %v927_v36, 0.0 }
  0xf5   : > { %v939_v40 = vmax.f32 %v923_v38, 0.0  ;;  %v1007_v1 = vmax.f32 %v1751_v3, %v943_v39 }
  0xf6   : > { %v887_v43 = vpop.f32.mrf.mxu3 }
  0xf7   : > { %v1003_v41 = vmax.f32 %v1749_v2, %v939_v40  ;;  %v908_v45 = vadd.f32 %v887_v43, %v710_v51  ;;  %1023 = vst [vmem:[%s1762_s30 + $0x60] sm:$0xff] %v1007_v1 }
  0xf8   : > { %v877_v44 = vpop.f32.mrf.mxu2  ;;  %v557_v48 = vpop.f32.mrf.mxu0 }
  0xf9   : > { %v904_v46 = vadd.f32 %v877_v44, %v700_v42  ;;  %1019 = vst [vmem:[%s1762_s30 + $0x40] sm:$0xff] %v1003_v41  ;;  %v928_v47 = vadd.f32 %v1737_v52, %v908_v45  ;;  %v702_v49 = vpop.f32.mrf.mxu1 }
  0xfa   : > { %v703_v2 = vadd.f32 %v702_v49, %v557_v48 }
  0xfb   : > { %v924_v50 = vadd.f32 %v1737_v52, %v904_v46  ;;  %v944_v13 = vmax.f32 %v928_v47, 0.0 }
  0xfd   : > { %v940_v3 = vmax.f32 %v924_v50, 0.0  ;;  %v1477_v54 = vpack.c.bf16 %v944_v13, %v943_v39  ;;  %v1008_v57 = vmax.f32 %v1755_v6, %v944_v13  ;;  %v715_v6 = vadd.f32 %v714_v20, %v1785_v32 }
  0xfe   : > { %v890_v58 = vpop.f32.mrf.mxu3 }
  0xff   : > { %v1467_v55 = vpack.c.bf16 %v940_v3, %v939_v40  ;;  %v1004_v56 = vmax.f32 %v1753_v5, %v940_v3  ;;  %1489 = vst [vmem:[%s1778_s10 + $0x30] sm:$0xff] %v1477_v54   ;;  %v909_v60 = vadd.f32 %v890_v58, %v713_v53 }
 0x100   : > { %v880_v59 = vpop.f32.mrf.mxu2  ;;  %1024 = vst [vmem:[%s1762_s30 + $0x68] sm:$0xff] %v1008_v57  ;;  %v559_v11 = vpop.f32.mrf.mxu0 }
 0x101   : > { %1487 = vst [vmem:[%s1778_s10 + $0x20] sm:$0xff] %v1467_v55   ;;  %v905_v61 = vadd.f32 %v880_v59, %v703_v2  ;;  %v929_v4 = vadd.f32 %v1737_v52, %v909_v60  ;;  %v704_v62 = vpop.f32.mrf.mxu1 }
 0x102   : > { %1020 = vst [vmem:[%s1762_s30 + $0x48] sm:$0xff] %v1004_v56  ;;  %v705_v16 = vadd.f32 %v704_v62, %v559_v11 }
 0x103   : > { %v925_v12 = vadd.f32 %v1737_v52, %v905_v61  ;;  %v945_v23 = vmax.f32 %v929_v4, 0.0 }
 0x105   : > { %v941_v5 = vmax.f32 %v925_v12, 0.0  ;;  %v1009_v14 = vmax.f32 %v1764_v8, %v945_v23 }
 0x106   : > { %v892_v17 = vpop.f32.mrf.mxu3 }
 0x107   : > { %v1005_v15 = vmax.f32 %v1757_v7, %v941_v5  ;;  %v910_v19 = vadd.f32 %v892_v17, %v715_v6  ;;  %1025 = vst [vmem:[%s1762_s30 + $0x70] sm:$0xff] %v1009_v14 }
 0x108   : > { %v882_v18 = vpop.f32.mrf.mxu2 }
 0x109   : > { %v906_v21 = vadd.f32 %v882_v18, %v705_v16  ;;  %1021 = vst [vmem:[%s1762_s30 + $0x50] sm:$0xff] %v1005_v15  ;;  %v930_v22 = vadd.f32 %v1737_v52, %v910_v19 }
 0x10b   : > { %v926_v24 = vadd.f32 %v1737_v52, %v906_v21  ;;  %v946_v32 = vmax.f32 %v930_v22, 0.0 }
 0x10d   : > { %v942_v20 = vmax.f32 %v926_v24, 0.0  ;;  %v1482_v8 = vpack.c.bf16 %v946_v32, %v945_v23  ;;  %v1010_v25 = vmax.f32 %v1768_v10, %v946_v32 }
 0x10f   : > { %v1472_v63 = vpack.c.bf16 %v942_v20, %v941_v5  ;;  %v1006_v7 = vmax.f32 %v1766_v9, %v942_v20  ;;  %1490 = vst [vmem:[%s1778_s10 + $0x38] sm:$0xff] %v1482_v8  }
 0x110   : > { %1026 = vst [vmem:[%s1762_s30 + $0x78] sm:$0xff] %v1010_v25 }
 0x111   : > { %1488 = vst [vmem:[%s1778_s10 + $0x28] sm:$0xff] %v1472_v63  }
 0x112   : > { %1022 = vst [vmem:[%s1762_s30 + $0x58] sm:$0xff] %v1006_v7 }
 0x113 PF: > { %s18_s24 = sadd.s32 1, %s1530_s24  }
 0x114   : > { %p15_p4 = scmp.ge.s32.totalorder %s18_s24, 4  }
 0x116   :  { %17 = sbr.rel (!%p15_p4) target bundleno = 1 (0x1), region = 97 }

// kernel: dea_gnn_jk_forward.10
= control target key start
LH: loop header
LB: loop body
LE: loop exit
PB: predicated region body
PF: predicated region fallthrough
CT: control target
= control target key end

     0   :  { %s1085_s24 = smov [#allocation4]   ;;  %s1086_s25 = smov [#allocation5]   ;;  %s1273_s0 = inlined_call_operand.vmem [shape: s32[2,2], index: 0, kind: input, shape index: {}]   ;;  %s1274_s2 = inlined_call_operand.vmem [shape: s8[256,256], index: 2, kind: input, shape index: {}]   ;;  %s1275_s3 = inlined_call_operand.vmem [shape: f32[256,1], index: 3, kind: input, shape index: {}]   ;;  %s1276_s4 = inlined_call_operand.vmem [shape: bf16[256,128], index: 4, kind: input, shape index: {}]   ;;  %s1277_s5 = inlined_call_operand.vmem [shape: bf16[256,128], index: 5, kind: output, shape index: {}]   ;;  %s1278_s1 = inlined_call_operand.vmem [shape: s32[2], index: 1, kind: input, shape index: {}]  }
   0x1   :  { %s11_s20 = sshll.u32 %s1273_s0, 4  ;;  %s16_s23 = sshll.u32 %s1278_s1, 4  ;;  %s12_s20 = int_to_ptr.vmem [resolvable:$true] %s11_s20  ;;  %s17_s23 = int_to_ptr.vmem [resolvable:$true] %s16_s23 }
   0x2   :  { %14 = dma.vmem_to_smem %s12_s20, 32, %s1085_s24, [#allocation3] }
   0x3   :  { %19 = dma.vmem_to_smem %s17_s23, 16, %s1086_s25, [#allocation3] }
   0x4   :  { %1055 = dma.done.wait [#allocation3], 48 }
   0x5   :  { %1056 = vsyncadd [#allocation3], 4294967248 }
   0x6   :  { %22 = sfence }
   0x7   :  { %s1125_s26 = smov 0   ;;  %s1127_s27 = smov 0  }
   0x8   :  { %s1129_s28 = smov 0   ;;  %s1131_s0 = smov 0  }
   0x9   :  { %s1133_s29 = smov 0   ;;  %s1135_s1 = smov 0  }
   0xa   :  { %s1137_s30 = smov 0  }
   0xb LB: > { %s37_s6 = sadd.s32 1, %s1075_s29  ;;  %s40_s7 = sadd.s32 1, %s1079_s1  ;;  %s1083_s30 = sphi %s1137_s30, %s28_s30   ;;  %s1079_s1 = sphi %s1135_s1, %s1284_s1   ;;  %s1075_s29 = sphi %s1133_s29, %s1283_s29   ;;  %s1071_s0 = sphi %s1131_s0, %s1282_s0   ;;  %s1067_s28 = sphi %s1129_s28, %s1281_s28   ;;  %s1063_s27 = sphi %s1127_s27, %s1280_s27   ;;  %s1059_s26 = sphi %s1125_s26, %s1279_s26  }
   0xc   : > { %p38_p0 = scmp.ge.s32.totalorder %s37_s6, 2  ;;  %s44_s8 = sshra.s32 %s1075_s29, 7 }
   0xd   : > { %s46_s9 = sadd.s32 %s1079_s1, %s44_s8  ;;  %s49_s10 = sand.u32 127, %s1075_s29 }
   0xe   : > { %s1286_s6 = smov (%p38_p0, %s37_s6), 0  ;;  %s1288_s7 = smov (!%p38_p0, %s40_s7), %s1079_s1 }
   0xf   : > { %s805_s11 = sshll.u32 %s46_s9, 7  ;;  %p42_p1 = scmp.ge.s32.totalorder %s1288_s7, 2 }
  0x10   : > { %s50_s12 = sadd.s32 %s805_s11, %s49_s10  ;;  %s52_s13 = sshra.s32 %s1286_s6, 7 }
  0x11   : > { %s1290_s7 = smov (%p42_p1, %s1288_s7), 0  ;;  %s57_s14 = sand.u32 127, %s1286_s6 }
  0x12   : > { %p72_p2 = scmp.ne.s32.totalorder %s1063_s27, %s1059_s26  ;;  %s51_s15 = sld [smem:[#allocation4 + %s50_s12]] }
  0x13   : > { %s54_s16 = sadd.s32 %s52_s13, %s1290_s7  ;;  %p73_p3 = scmp.eq.s32.totalorder %s1083_s30, 0 }
  0x14   : > { %s806_s17 = sshll.u32 %s54_s16, 7  ;;  %s60_s20 = ssub.s32 %s1079_s1, %s1290_s7 }
  0x15   : > { %s58_s18 = sadd.s32 %s806_s17, %s57_s14  ;;  %p74_p4 = por %p73_p3, %p72_p2 }
  0x16   : > { %s59_s19 = sld [smem:[#allocation4 + %s58_s18]]  ;;  %s65_s23 = sadd.s32 1, %s1063_s27 }
  0x17   : > { %p808_p6 = scmp.ge.s32.totalorder %s1083_s30, 4 }
  0x1c   : > { %s61_s21 = ssub.s32 %s51_s15, %s59_s19  ;;  %174 = sbr.rel (%p808_p6) target bundleno = 47 (0x2f), region = 20 }
  0x1d   : > { %s62_s22 = sor.u32 %s61_s21, %s60_s20 }
  0x1e   : > { %p63_p5 = scmp.eq.s32.totalorder %s62_s22, 0 }
  0x20   : > { %s1180_s24 = scalar_select %p63_p5, %s1063_s27, %s65_s23  }
  0x21   : > { %177 = sbr.rel (!%p74_p4) target bundleno = 47 (0x2f), region = 24  ;;  %s189_s25 = sld [smem:[#allocation4 + %s50_s12]] (%p74_p4) }
  0x22   : > { %s179_s8 = sand.u32 (%p74_p4), 1, %s1063_s27   ;;  %s860_s9 = sshll.u32 (%p74_p4), %s1079_s1, 3 }
  0x23   : > { %s809_s10 = sshll.u32 (%p74_p4), %s179_s8, 5 }
  0x24   : > { %s181_s17 = scalar_lea.vmem (%p74_p4), [#allocation6], %s809_s10 }
  0x27   : > { %s192_s11 = sadd.s32 %s860_s9, %s189_s25 }
  0x28   : > { %s813_s13 = sshll.u32 %s192_s11, 3 }
  0x29   : > { %s194_s15 = scalar_lea.vmem %s1274_s2, %s813_s13 }
  0x2a   : > { %v229_v0 = vld [vmem:[%s194_s15] sm:$0xff]  ;;  %v231_v1 = vld [vmem:[%s194_s15 + $0x10] sm:$0xff] }
  0x2b   : > { %v233_v2 = vld [vmem:[%s194_s15 + $0x20] sm:$0xff]  ;;  %230 = vst [vmem:[%s181_s17] sm:$0xff] %v229_v0  ;;  %v235_v3 = vld [vmem:[%s194_s15 + $0x30] sm:$0xff] }
  0x2c   : > { %232 = vst [vmem:[%s181_s17 + $0x8] sm:$0xff] %v231_v1 }
  0x2d   : > { %234 = vst [vmem:[%s181_s17 + $0x10] sm:$0xff] %v233_v2 }
  0x2e   : > { %236 = vst [vmem:[%s181_s17 + $0x18] sm:$0xff] %v235_v3 }
  0x2f PF: > { %p814_p7 = scmp.ge.s32.totalorder %s1083_s30, 1  ;;  %p250_p8 = scmp.lt.s32.totalorder %s1083_s30, 5 }
  0x31   : > { %p251_p9 = pnand %p814_p7, %p250_p8 }
  0x32   : > { %s257_s12 = sand.u32 (!%p251_p9), 1, %s1059_s26   ;;  %s816_s18 = sshll.u32 (!%p251_p9), %s1071_s0, 4 }
  0x33   : > { %254 = sbr.rel (%p251_p9) target bundleno = 462 (0x1ce), region = 66  ;;  %s815_s19 = sshll.u32 (!%p251_p9), %s257_s12, 5 }
  0x34   : > { %p295_p10 = scmp.lt.s32.totalorder (!%p251_p9), %s816_s18, 31  ;;  %s1202_s11 = scalar_lea.vmem (!%p251_p9), [#allocation6], %s815_s19 }
  0x35   : > { %p820_p11 = scmp.ne.s32.totalorder (!%p251_p9), %s1067_s28, 0 }
  0x38   : > { %s1292_s18 = smov (!%p295_p10, %s816_s18), 31  ;;  %309 = sbr.rel (%p820_p11) target bundleno = 78 (0x4e), region = 74 }
  0x39   : > { %s817_s20 = sshll.u32 %s1292_s18, 3  ;;  %s819_s21 = sshll.u32 %s1292_s18, 2 }
  0x3a   : > { %s1195_s25 = scalar_lea.vmem %s1275_s3, %s817_s20  ;;  %s1200_s10 = scalar_lea.vmem %s1277_s5, %s819_s21 }
  0x3d   : > { %v1087_v4 = vmov 0.0  }
  0x3e   : > { %310 = vst [vmem:[#allocation2 + $0x30] sm:$0xff] %v1087_v4 }
  0x3f   : > { %311 = vst [vmem:[#allocation2] sm:$0xff] %v1087_v4 }
  0x40   : > { %312 = vst [vmem:[#allocation2 + $0x58] sm:$0xff] %v1087_v4 }
  0x41   : > { %313 = vst [vmem:[#allocation2 + $0x18] sm:$0xff] %v1087_v4 }
  0x42   : > { %314 = vst [vmem:[#allocation2 + $0x50] sm:$0xff] %v1087_v4 }
  0x43   : > { %315 = vst [vmem:[#allocation2 + $0x68] sm:$0xff] %v1087_v4 }
  0x44   : > { %316 = vst [vmem:[#allocation2 + $0x8] sm:$0xff] %v1087_v4 }
  0x45   : > { %317 = vst [vmem:[#allocation2 + $0x48] sm:$0xff] %v1087_v4 }
  0x46   : > { %318 = vst [vmem:[#allocation2 + $0x40] sm:$0xff] %v1087_v4 }
  0x47   : > { %319 = vst [vmem:[#allocation2 + $0x20] sm:$0xff] %v1087_v4 }
  0x48   : > { %320 = vst [vmem:[#allocation2 + $0x10] sm:$0xff] %v1087_v4 }
  0x49   : > { %321 = vst [vmem:[#allocation2 + $0x38] sm:$0xff] %v1087_v4 }
  0x4a   : > { %322 = vst [vmem:[#allocation2 + $0x60] sm:$0xff] %v1087_v4 }
  0x4b   : > { %323 = vst [vmem:[#allocation2 + $0x70] sm:$0xff] %v1087_v4 }
  0x4c   : > { %324 = vst [vmem:[#allocation2 + $0x78] sm:$0xff] %v1087_v4 }
  0x4d   : > { %325 = vst [vmem:[#allocation2 + $0x28] sm:$0xff] %v1087_v4 }
  0x4e PF: > { %s326_s26 = sld [smem:[#allocation5 + %s1071_s0]] }
  0x54   : > { %p821_p12 = scmp.ge.s32.totalorder %s1067_s28, %s326_s26 }
  0x55   : > { %s375_s13 = sshra.s32 (!%p821_p12), %s1067_s28, 7  ;;  %s380_s14 = sand.u32 (!%p821_p12), 127, %s1067_s28 }
  0x56   : > { %330 = sbr.rel (%p821_p12) target bundleno = 292 (0x124), region = 78  ;;  %s377_s16 = sadd.s32 (!%p821_p12), %s1071_s0, %s375_s13 }
  0x57   : > { %s822_s15 = sshll.u32 (!%p821_p12), %s377_s16, 7 }
  0x58   : > { %s381_s17 = sadd.s32 (!%p821_p12), %s822_s15, %s380_s14 }
  0x59   : > { %s382_s12 = sld [smem:[#allocation4 + %s381_s17]] (!%p821_p12) }
  0x5b   : > { %v331_v11 = vld [vmem:[%s1202_s11] sm:$0xff]  ;;  %v332_v12 = vld [vmem:[%s1202_s11 + $0x8] sm:$0xff]  ;;  %v333_v13 = vld [vmem:[%s1202_s11 + $0x10] sm:$0xff] }
  0x5c   : > { %v334_v14 = vld [vmem:[%s1202_s11 + $0x18] sm:$0xff]  ;;  %v335_v15 = vunpack.c.0.s8 %v331_v11  ;;  %v336_v16 = vunpack.c.1.s8 %v331_v11  ;;  %v339_v17 = vunpack.c.0.s8 %v332_v12  ;;  %v340_v18 = vunpack.c.1.s8 %v332_v12  ;;  %v404_v57 = vld [vmem:[#allocation2 + $0x30] sm:$0xff]  ;;  %v412_v63 = vld [vmem:[#allocation2 + $0x40] sm:$0xff] }
  0x5d   : > { %v343_v20 = vunpack.c.0.s8 %v333_v13  ;;  %v344_v21 = vunpack.c.1.s8 %v333_v13  ;;  %v347_v22 = vunpack.c.0.s8 %v334_v14  ;;  %v348_v23 = vunpack.c.1.s8 %v334_v14  ;;  %v408_v58 = vld [vmem:[#allocation2 + $0x50] sm:$0xff]  ;;  %v416_v0 = vld [vmem:[#allocation2 + $0x60] sm:$0xff]  ;;  %v409_v2 = vld [vmem:[#allocation2 + $0x68] sm:$0xff] }
  0x5e   : > { %v351_v24 = vcvt.s32.f32 %v335_v15  ;;  %v352_v25 = vcvt.s32.f32 %v336_v16  ;;  %v355_v26 = vcvt.s32.f32 %v339_v17  ;;  %v356_v27 = vcvt.s32.f32 %v340_v18  ;;  %v405_v1 = vld [vmem:[#allocation2] sm:$0xff] }
  0x5f   : > { %s823_s18 = sshll.u32 %s382_s12, 7  ;;  %v359_v29 = vcvt.s32.f32 %v343_v20  ;;  %v360_v30 = vcvt.s32.f32 %v344_v21  ;;  %v363_v31 = vcvt.s32.f32 %v347_v22  ;;  %v364_v32 = vcvt.s32.f32 %v348_v23  ;;  %v414_v23 = vld [vmem:[#allocation2 + $0x10] sm:$0xff] }
  0x60   : > { %s384_s19 = sshra.s32 %s823_s18, 3  ;;  %v367_v33 = vpack.c.bf16 %v352_v25, %v351_v24  ;;  %v369_v34 = vpack.c.bf16 %v356_v27, %v355_v26  ;;  %v337_v37 = vunpack.c.2.s8 %v331_v11  ;;  %v338_v38 = vunpack.c.3.s8 %v331_v11  ;;  %v413_v11 = vld [vmem:[#allocation2 + $0x20] sm:$0xff]  ;;  %v418_v24 = vld [vmem:[#allocation2 + $0x78] sm:$0xff]  ;;  %v411_v26 = vld [vmem:[#allocation2 + $0x48] sm:$0xff] }
  0x61   : > { %s824_s20 = sshll.u32 %s384_s19, 2  ;;  %v371_v35 = vpack.c.bf16 %v360_v30, %v359_v29  ;;  %v373_v36 = vpack.c.bf16 %v364_v32, %v363_v31  ;;  %v341_v39 = vunpack.c.2.s8 %v332_v12  ;;  %v342_v40 = vunpack.c.3.s8 %v332_v12  ;;  %v417_v12 = vld [vmem:[#allocation2 + $0x70] sm:$0xff]  ;;  %v407_v25 = vld [vmem:[#allocation2 + $0x18] sm:$0xff] }
  0x62   : > { %s1213_s23 = scalar_lea.vmem %s1276_s4, %s824_s20  ;;  %v345_v41 = vunpack.c.2.s8 %v333_v13  ;;  %v346_v42 = vunpack.c.3.s8 %v333_v13  ;;  %v349_v43 = vunpack.c.2.s8 %v334_v14  ;;  %v350_v44 = vunpack.c.3.s8 %v334_v14  ;;  %v406_v13 = vld [vmem:[#allocation2 + $0x58] sm:$0xff]  ;;  %v410_v14 = vld [vmem:[#allocation2 + $0x8] sm:$0xff] }
  0x63   : > { %v868_v5 = vld [vmem:[%s1213_s23 + $0x38] sm:$0xff]  ;;  %v867_v6 = vld [vmem:[%s1213_s23 + $0x30] sm:$0xff]  ;;  %v866_v7 = vld [vmem:[%s1213_s23 + $0x28] sm:$0xff]  ;;  %v353_v45 = vcvt.s32.f32 %v337_v37  ;;  %v354_v46 = vcvt.s32.f32 %v338_v38  ;;  %v357_v47 = vcvt.s32.f32 %v341_v39  ;;  %v358_v48 = vcvt.s32.f32 %v342_v40 }
  0x64   : > { %468 = vmatpush.bf16.msra.mxu0 %v868_v5  ;;  %916 = vmatpush.bf16.msra.mxu1 %v868_v5  ;;  %v865_v8 = vld [vmem:[%s1213_s23 + $0x20] sm:$0xff]  ;;  %v864_v9 = vld [vmem:[%s1213_s23 + $0x18] sm:$0xff]  ;;  %v863_v10 = vld [vmem:[%s1213_s23 + $0x10] sm:$0xff]  ;;  %v361_v49 = vcvt.s32.f32 %v345_v41  ;;  %v362_v50 = vcvt.s32.f32 %v346_v42  ;;  %v365_v51 = vcvt.s32.f32 %v349_v43  ;;  %v366_v52 = vcvt.s32.f32 %v350_v44 }
  0x65   : > { %917 = vmatpush.bf16.msra.mxu2 %v868_v5  ;;  %918 = vmatpush.bf16.msra.mxu3 %v868_v5  ;;  %v862_v19 = vld [vmem:[%s1213_s23 + $0x8] sm:$0xff]  ;;  %v861_v28 = vld [vmem:[%s1213_s23] sm:$0xff]  ;;  %v368_v53 = vpack.c.bf16 %v354_v46, %v353_v45  ;;  %v370_v54 = vpack.c.bf16 %v358_v48, %v357_v47 }
  0x66   : > { %v372_v55 = vpack.c.bf16 %v362_v50, %v361_v49  ;;  %v374_v56 = vpack.c.bf16 %v366_v52, %v365_v51 }
  0x68   : > { %469 = vmatpush.bf16.msra.mxu0 %v867_v6  ;;  %919 = vmatpush.bf16.msra.mxu1 %v867_v6 }
  0x69   : > { %920 = vmatpush.bf16.msra.mxu2 %v867_v6  ;;  %921 = vmatpush.bf16.msra.mxu3 %v867_v6 }
  0x6c   : > { %470 = vmatpush.bf16.msra.mxu0 %v866_v7  ;;  %922 = vmatpush.bf16.msra.mxu1 %v866_v7 }
  0x6d   : > { %923 = vmatpush.bf16.msra.mxu2 %v866_v7  ;;  %924 = vmatpush.bf16.msra.mxu3 %v866_v7 }
  0x70   : > { %471 = vmatpush.bf16.msra.mxu0 %v865_v8  ;;  %925 = vmatpush.bf16.msra.mxu1 %v865_v8 }
  0x71   : > { %926 = vmatpush.bf16.msra.mxu2 %v865_v8  ;;  %927 = vmatpush.bf16.msra.mxu3 %v865_v8 }
  0x74   : > { %472 = vmatpush.bf16.msra.mxu0 %v864_v9  ;;  %928 = vmatpush.bf16.msra.mxu1 %v864_v9 }
  0x75   : > { %929 = vmatpush.bf16.msra.mxu2 %v864_v9  ;;  %930 = vmatpush.bf16.msra.mxu3 %v864_v9 }
  0x78   : > { %473 = vmatpush.bf16.msra.mxu0 %v863_v10  ;;  %931 = vmatpush.bf16.msra.mxu1 %v863_v10 }
  0x79   : > { %932 = vmatpush.bf16.msra.mxu2 %v863_v10  ;;  %933 = vmatpush.bf16.msra.mxu3 %v863_v10 }
  0x7c   : > { %474 = vmatpush.bf16.msra.mxu0 %v862_v19  ;;  %934 = vmatpush.bf16.msra.mxu1 %v862_v19 }
  0x7d   : > { %935 = vmatpush.bf16.msra.mxu2 %v862_v19  ;;  %936 = vmatpush.bf16.msra.mxu3 %v862_v19 }
  0x80   : > { %475 = vmatpush.bf16.msra.mxu0 %v861_v28  ;;  %937 = vmatpush.bf16.msra.mxu1 %v861_v28 }
  0x81   : > { %938 = vmatpush.bf16.msra.mxu2 %v861_v28  ;;  %939 = vmatpush.bf16.msra.mxu3 %v861_v28 }
  0x83   : > { %476 = vmatmul.bf16.vlgmr.msra.gmra.mxu0 %v367_v33  ;;  %486 = vmatmul.bf16.vlgmr.msra.gmra.mxu1 %v369_v34 }
  0x84   : > { %496 = vmatmul.bf16.vlgmr.msra.gmra.mxu2 %v371_v35  ;;  %506 = vmatmul.bf16.vlgmr.msra.gmra.mxu3 %v373_v36  ;;  %v415_v35 = vld [vmem:[#allocation2 + $0x38] sm:$0xff]  ;;  %v419_v36 = vld [vmem:[#allocation2 + $0x28] sm:$0xff] }
  0x93   : > { %481 = vmatmul.bf16.gmra.mxu0 %v368_v53  ;;  %491 = vmatmul.bf16.gmra.mxu1 %v370_v54 }
  0x94   : > { %501 = vmatmul.bf16.gmra.mxu2 %v372_v55  ;;  %511 = vmatmul.bf16.gmra.mxu3 %v374_v56 }
 0x100   : > { %v477_v59 = vpop.f32.mrf.mxu0  ;;  %v487_v60 = vpop.f32.mrf.mxu1 }
 0x101   : > { %v517_v61 = vadd.f32 %v477_v59, %v404_v57  ;;  %v521_v62 = vadd.f32 %v487_v60, %v408_v58 }
 0x103   : > { %533 = vst [vmem:[#allocation2 + $0x30] sm:$0xff] %v517_v61 }
 0x104   : > { %537 = vst [vmem:[#allocation2 + $0x50] sm:$0xff] %v521_v62 }
 0x107   : > { %v497_v3 = vpop.f32.mrf.mxu2  ;;  %v507_v4 = vpop.f32.mrf.mxu3 }
 0x108   : > { %v525_v5 = vadd.f32 %v497_v3, %v412_v63  ;;  %v529_v6 = vadd.f32 %v507_v4, %v416_v0  ;;  %v479_v7 = vpop.f32.mrf.mxu0  ;;  %v489_v8 = vpop.f32.mrf.mxu1 }
 0x109   : > { %v518_v9 = vadd.f32 %v479_v7, %v405_v1  ;;  %v522_v10 = vadd.f32 %v489_v8, %v409_v2 }
 0x10a   : > { %541 = vst [vmem:[#allocation2 + $0x40] sm:$0xff] %v525_v5 }
 0x10b   : > { %545 = vst [vmem:[#allocation2 + $0x60] sm:$0xff] %v529_v6 }
 0x10c   : > { %534 = vst [vmem:[#allocation2] sm:$0xff] %v518_v9 }
 0x10d   : > { %538 = vst [vmem:[#allocation2 + $0x68] sm:$0xff] %v522_v10 }
 0x10f   : > { %v499_v15 = vpop.f32.mrf.mxu2  ;;  %v509_v16 = vpop.f32.mrf.mxu3 }
 0x110   : > { %v526_v17 = vadd.f32 %v499_v15, %v413_v11  ;;  %v530_v18 = vadd.f32 %v509_v16, %v417_v12  ;;  %v482_v19 = vpop.f32.mrf.mxu0  ;;  %v492_v20 = vpop.f32.mrf.mxu1 }
 0x111   : > { %v519_v21 = vadd.f32 %v482_v19, %v406_v13  ;;  %v523_v22 = vadd.f32 %v492_v20, %v410_v14 }
 0x112   : > { %542 = vst [vmem:[#allocation2 + $0x20] sm:$0xff] %v526_v17 }
 0x113   : > { %546 = vst [vmem:[#allocation2 + $0x70] sm:$0xff] %v530_v18 }
 0x114   : > { %535 = vst [vmem:[#allocation2 + $0x58] sm:$0xff] %v519_v21 }
 0x115   : > { %539 = vst [vmem:[#allocation2 + $0x8] sm:$0xff] %v523_v22 }
 0x117   : > { %v502_v27 = vpop.f32.mrf.mxu2  ;;  %v512_v28 = vpop.f32.mrf.mxu3 }
 0x118   : > { %v527_v29 = vadd.f32 %v502_v27, %v414_v23  ;;  %v531_v30 = vadd.f32 %v512_v28, %v418_v24  ;;  %v484_v31 = vpop.f32.mrf.mxu0  ;;  %v494_v32 = vpop.f32.mrf.mxu1 }
 0x119   : > { %v520_v33 = vadd.f32 %v484_v31, %v407_v25  ;;  %v524_v34 = vadd.f32 %v494_v32, %v411_v26 }
 0x11a   : > { %543 = vst [vmem:[#allocation2 + $0x10] sm:$0xff] %v527_v29 }
 0x11b   : > { %547 = vst [vmem:[#allocation2 + $0x78] sm:$0xff] %v531_v30 }
 0x11c   : > { %536 = vst [vmem:[#allocation2 + $0x18] sm:$0xff] %v520_v33 }
 0x11d   : > { %540 = vst [vmem:[#allocation2 + $0x48] sm:$0xff] %v524_v34 }
 0x11f   : > { %v504_v37 = vpop.f32.mrf.mxu2  ;;  %v514_v38 = vpop.f32.mrf.mxu3 }
 0x120   : > { %v528_v39 = vadd.f32 %v504_v37, %v415_v35  ;;  %v532_v40 = vadd.f32 %v514_v38, %v419_v36 }
 0x122   : > { %544 = vst [vmem:[#allocation2 + $0x38] sm:$0xff] %v528_v39 }
 0x123   : > { %548 = vst [vmem:[#allocation2 + $0x28] sm:$0xff] %v532_v40 }
 0x124 PF: > { %p857_p13 = scmp.ne.s32.totalorder %s1067_s28, 1 }
 0x126   : > { %552 = sbr.rel (%p857_p13) target bundleno = 462 (0x1ce), region = 82 }
 0x12b   : > { %v573_v41 = vld [vmem:[%s1195_s25 + $0x20] sm:$0xff]  ;;  %v571_v42 = vld [vmem:[%s1195_s25 + $0x10] sm:$0xff]  ;;  %v1088_v44 = vmov 0   ;;  %v574_v45 = vld [vmem:[%s1195_s25 + $0x28] sm:$0xff] }
 0x12c   : > { %v569_v43 = vld [vmem:[%s1195_s25] sm:$0xff]  ;;  %1002 = vset.pattern.permute.xlu2 %v1088_v44  ;;  %1001 = vset.pattern.permute.xlu1 %v1088_v44  ;;  %v572_v46 = vld [vmem:[%s1195_s25 + $0x18] sm:$0xff]  ;;  %v570_v47 = vld [vmem:[%s1195_s25 + $0x8] sm:$0xff] }
 0x12d   : > { %1000 = vset.pattern.permute.xlu0 %v1088_v44  ;;  %607 = vperm.xlu2 %1002, %v573_v41   ;;  %v577_v48 = vld [vmem:[%s1195_s25 + $0x40] sm:$0xff]  ;;  %v576_v49 = vld [vmem:[%s1195_s25 + $0x38] sm:$0xff]  ;;  %v575_v50 = vld [vmem:[%s1195_s25 + $0x30] sm:$0xff] }
 0x12e   : > { %597 = vperm.xlu1 %1001, %v571_v42   ;;  %587 = vperm.xlu0 %1000, %v569_v43   ;;  %v580_v51 = vld [vmem:[%s1195_s25 + $0x58] sm:$0xff]  ;;  %v579_v52 = vld [vmem:[%s1195_s25 + $0x50] sm:$0xff]  ;;  %v578_v53 = vld [vmem:[%s1195_s25 + $0x48] sm:$0xff] }
 0x12f   : > { %v583_v54 = vld [vmem:[%s1195_s25 + $0x70] sm:$0xff]  ;;  %v582_v55 = vld [vmem:[%s1195_s25 + $0x68] sm:$0xff]  ;;  %v581_v56 = vld [vmem:[%s1195_s25 + $0x60] sm:$0xff] }
 0x130   : > { %v584_v57 = vld [vmem:[%s1195_s25 + $0x78] sm:$0xff]  ;;  %v557_v59 = vld [vmem:[#allocation2 + $0x50] sm:$0xff]  ;;  %v558_v60 = vld [vmem:[#allocation2 + $0x68] sm:$0xff] }
 0x131   : > { %v555_v3 = vld [vmem:[#allocation2 + $0x58] sm:$0xff]  ;;  %v553_v4 = vld [vmem:[#allocation2 + $0x30] sm:$0xff]  ;;  %v554_v6 = vld [vmem:[#allocation2] sm:$0xff] }
 0x132   : > { %v556_v5 = vld [vmem:[#allocation2 + $0x18] sm:$0xff]  ;;  %v560_v16 = vld [vmem:[#allocation2 + $0x48] sm:$0xff]  ;;  %v561_v23 = vld [vmem:[#allocation2 + $0x40] sm:$0xff] }
 0x133   : > { %v559_v17 = vld [vmem:[#allocation2 + $0x8] sm:$0xff]  ;;  %v564_v24 = vld [vmem:[#allocation2 + $0x38] sm:$0xff]  ;;  %v563_v25 = vld [vmem:[#allocation2 + $0x10] sm:$0xff] }
 0x134   : > { %v562_v26 = vld [vmem:[#allocation2 + $0x20] sm:$0xff]  ;;  %v566_v36 = vld [vmem:[#allocation2 + $0x70] sm:$0xff]  ;;  %v567_v44 = vld [vmem:[#allocation2 + $0x78] sm:$0xff] }
 0x135   : > { %612 = vperm.xlu2 %1002, %v574_v45   ;;  %v565_v37 = vld [vmem:[#allocation2 + $0x60] sm:$0xff]  ;;  %v568_v45 = vld [vmem:[#allocation2 + $0x28] sm:$0xff] }
 0x136   : > { %602 = vperm.xlu1 %1001, %v572_v46   ;;  %592 = vperm.xlu0 %1000, %v570_v47  }
 0x13d   : > { %627 = vperm.xlu2 %1002, %v577_v48  }
 0x13e   : > { %622 = vperm.xlu1 %1001, %v576_v49   ;;  %617 = vperm.xlu0 %1000, %v575_v50  }
 0x145   : > { %642 = vperm.xlu2 %1002, %v580_v51  }
 0x146   : > { %637 = vperm.xlu1 %1001, %v579_v52   ;;  %632 = vperm.xlu0 %1000, %v578_v53  }
 0x14d   : > { %657 = vperm.xlu2 %1002, %v583_v54  }
 0x14e   : > { %652 = vperm.xlu1 %1001, %v582_v55   ;;  %647 = vperm.xlu0 %1000, %v581_v56  }
 0x156   : > { %662 = vperm.xlu0 %1000, %v584_v57  }
 0x187   : > { %v608_v58 = vpop.permute.xlu2 %607 }
 0x188   : > { %v669_v61 = vmul.f32 %v608_v58, %v557_v59 }
 0x18f   : > { %v613_v62 = vpop.permute.xlu2 %612 }
 0x190   : > { %v670_v63 = vmul.f32 %v613_v62, %v558_v60 }
 0x192   : > { %v882_v0 = vpack.c.bf16 %v670_v63, %v669_v61 }
 0x194   : > { %910 = vst [vmem:[%s1200_s10 + $0x10] sm:$0xff] %v882_v0  }
 0x197   : > { %v628_v15 = vpop.permute.xlu2 %627 }
 0x198   : > { %v673_v30 = vmul.f32 %v628_v15, %v561_v23 }
 0x19f   : > { %v643_v27 = vpop.permute.xlu2 %642 }
 0x1a0   : > { %v598_v1 = vpop.permute.xlu1 %597  ;;  %v588_v2 = vpop.permute.xlu0 %587  ;;  %v676_v31 = vmul.f32 %v643_v27, %v564_v24 }
 0x1a1   : > { %v667_v7 = vmul.f32 %v598_v1, %v555_v3  ;;  %v665_v10 = vmul.f32 %v588_v2, %v553_v4 }
 0x1a7   : > { %v658_v43 = vpop.permute.xlu2 %657 }
 0x1a8   : > { %v603_v8 = vpop.permute.xlu1 %602  ;;  %v593_v9 = vpop.permute.xlu0 %592  ;;  %v679_v47 = vmul.f32 %v658_v43, %v567_v44 }
 0x1a9   : > { %v668_v11 = vmul.f32 %v603_v8, %v556_v5  ;;  %v666_v12 = vmul.f32 %v593_v9, %v554_v6 }
 0x1ab   : > { %v877_v13 = vpack.c.bf16 %v668_v11, %v667_v7  ;;  %v872_v14 = vpack.c.bf16 %v666_v12, %v665_v10 }
 0x1ad   : > { %909 = vst [vmem:[%s1200_s10 + $0x8] sm:$0xff] %v877_v13  }
 0x1ae   : > { %873 = vst [vmem:[%s1200_s10] sm:$0xff] %v872_v14  }
 0x1b0   : > { %v623_v18 = vpop.permute.xlu1 %622  ;;  %v618_v19 = vpop.permute.xlu0 %617 }
 0x1b1   : > { %v672_v20 = vmul.f32 %v623_v18, %v560_v16  ;;  %v671_v21 = vmul.f32 %v618_v19, %v559_v17 }
 0x1b3   : > { %v887_v22 = vpack.c.bf16 %v672_v20, %v671_v21 }
 0x1b5   : > { %911 = vst [vmem:[%s1200_s10 + $0x18] sm:$0xff] %v887_v22  }
 0x1b8   : > { %v638_v28 = vpop.permute.xlu1 %637  ;;  %v633_v29 = vpop.permute.xlu0 %632 }
 0x1b9   : > { %v675_v32 = vmul.f32 %v638_v28, %v563_v25  ;;  %v674_v33 = vmul.f32 %v633_v29, %v562_v26 }
 0x1bb   : > { %v897_v34 = vpack.c.bf16 %v676_v31, %v675_v32  ;;  %v892_v35 = vpack.c.bf16 %v674_v33, %v673_v30 }
 0x1bd   : > { %913 = vst [vmem:[%s1200_s10 + $0x28] sm:$0xff] %v897_v34  }
 0x1be   : > { %912 = vst [vmem:[%s1200_s10 + $0x20] sm:$0xff] %v892_v35  }
 0x1c0   : > { %v653_v38 = vpop.permute.xlu1 %652  ;;  %v648_v39 = vpop.permute.xlu0 %647 }
 0x1c1   : > { %v678_v40 = vmul.f32 %v653_v38, %v566_v36  ;;  %v677_v41 = vmul.f32 %v648_v39, %v565_v37 }
 0x1c3   : > { %v902_v42 = vpack.c.bf16 %v678_v40, %v677_v41 }
 0x1c5   : > { %914 = vst [vmem:[%s1200_s10 + $0x30] sm:$0xff] %v902_v42  }
 0x1c8   : > { %v663_v46 = vpop.permute.xlu0 %662 }
 0x1c9   : > { %v680_v48 = vmul.f32 %v663_v46, %v568_v45 }
 0x1cb   : > { %v907_v49 = vpack.c.bf16 %v680_v48, %v679_v47 }
 0x1cd   : > { %915 = vst [vmem:[%s1200_s10 + $0x38] sm:$0xff] %v907_v49  }
 0x1ce PF: > { %s28_s30 = sadd.s32 1, %s1083_s30   ;;  %s1279_s26 = smov %s1063_s27 }
 0x1cf   : > { %p25_p0 = scmp.ge.s32.totalorder %s28_s30, 6   ;;  %s1280_s27 = smov %s1180_s24 }
 0x1d0   : > { %s1281_s28 = smov %s1075_s29  ;;  %s1282_s0 = smov %s1079_s1 }
 0x1d1   : > { %s1283_s29 = smov %s1286_s6  ;;  %s1284_s1 = smov %s1290_s7 }
 0x1d2   :  { %27 = sbr.rel (!%p25_p0) target bundleno = 11 (0xb), region = 121 }

// kernel: dea_gnn_jk_forward.19
= control target key start
LH: loop header
LB: loop body
LE: loop exit
PB: predicated region body
PF: predicated region fallthrough
CT: control target
= control target key end

     0   :  { %s1032_s0 = inlined_call_operand.vmem [shape: bf16[256,128], index: 0, kind: input, shape index: {}]   ;;  %s1033_s1 = inlined_call_operand.vmem [shape: bf16[256,128], index: 1, kind: input, shape index: {}]   ;;  %s1034_s2 = inlined_call_operand.vmem [shape: bf16[128,128], index: 2, kind: input, shape index: {}]   ;;  %s1035_s3 = inlined_call_operand.vmem [shape: f32[1,128], index: 3, kind: input, shape index: {}]   ;;  %s1036_s4 = inlined_call_operand.vmem [shape: bf16[1,128], index: 4, kind: input, shape index: {}]   ;;  %s1037_s5 = inlined_call_operand.<no memory space> [shape: f32[1,1], index: 5, kind: input, shape index: {}]   ;;  %s1038_s6 = inlined_call_operand.hbm [shape: f32[1,256], index: 6, kind: output, shape index: {}]  }
   0x1   :  { %v11_v0 = vstv %s1037_s5 }
   0x2   :  { %12 = vst [vmem:[#allocation2] sm:$0x1] %v11_v0 }
   0x3   :  { %13 = vsyncpa [#allocation4], 0 }
   0x4   :  { %15 = vsyncpa [#allocation4 + $0x1], 0  ;;  %s895_s23 = smov 0   ;;  %s897_s24 = smov 0  }
   0x5   :  { %s899_s25 = smov 0   ;;  %s901_s26 = smov 0  }
   0x6 LB: > { %s916_s5 = sadd.s32 4294967295, %s854_s26   ;;  %s606_s27 = sadd.s32 4294967294, %s854_s26   ;;  %s854_s26 = sphi %s901_s26, %s1044_s26   ;;  %s850_s25 = sphi %s899_s25, %s1043_s25   ;;  %s846_s24 = sphi %s897_s24, %s1042_s24   ;;  %s842_s23 = sphi %s895_s23, %s1041_s23  }
   0x7   : > { %s920_s28 = sadd.s32 1, %s854_s26   ;;  %s164_s29 = sadd.s32 1, %s850_s25 }
   0x8   : > { %s161_s30 = ssub.s32 %s854_s26, %s920_s28  ;;  %p174_p0 = scmp.ne.s32.totalorder %s850_s25, %s846_s24 }
   0x9   : > { %p162_p1 = scmp.eq.s32.totalorder %s161_s30, 0  ;;  %p175_p2 = scmp.eq.s32.totalorder %s916_s5, 1 }
   0xa   : > { %p180_p3 = scmp.ne.s32.totalorder %s846_s24, %s842_s23  ;;  %p181_p4 = scmp.eq.s32.totalorder %s606_s27, 1 }
   0xb   : > { %s931_s7 = scalar_select %p162_p1, %s850_s25, %s164_s29  }
   0xc   : > { %p933_p5 = por %p175_p2, %p174_p0  ;;  %p937_p6 = por %p181_p4, %p180_p3 }
   0xd   : > { %p609_p7 = scmp.ge.s32.totalorder %s854_s26, 1  ;;  %p229_p8 = scmp.lt.s32.totalorder %s854_s26, 3 }
   0xf   : > { %p230_p9 = pnand %p609_p7, %p229_p8 }
  0x10   : > { %s610_s12 = sshll.u32 (!%p230_p9), %s916_s5, 4  ;;  %s261_s22 = sand.u32 (!%p230_p9), 1, %s846_s24  }
  0x11   : > { %233 = sbr.rel (%p230_p9) target bundleno = 413 (0x19d), region = 44  ;;  %p264_p10 = scmp.lt.s32.totalorder (!%p230_p9), %s610_s12, 31 }
  0x12   : > { %s535_s30 = scalar_lea.hbm (!%p230_p9), %s1038_s6, %s916_s5  ;;  %s262_s10 = scalar_lea.vmem (!%p230_p9), [#allocation3], %s261_s22 }
  0x13   : > { %s527_s13 = scalar_lea.sflag (!%p230_p9), [#allocation4], %s261_s22  ;;  %s812_s5 = scalar_lea.hbm (!%p230_p9), %s1038_s6, 2 }
  0x16   : > { %v655_v1 = vld [vmem:[%s1034_s2 + $0x38] sm:$0xff]  ;;  %v654_v2 = vld [vmem:[%s1034_s2 + $0x30] sm:$0xff]  ;;  %v653_v3 = vld [vmem:[%s1034_s2 + $0x28] sm:$0xff]  ;;  %s1046_s12 = smov (!%p264_p10, %s610_s12), 31 }
  0x17   : > { %734 = vmatpush.bf16.msra.mxu2 %v655_v1  ;;  %735 = vmatpush.bf16.msra.mxu3 %v655_v1  ;;  %v652_v4 = vld [vmem:[%s1034_s2 + $0x20] sm:$0xff]  ;;  %s611_s19 = sshll.u32 %s1046_s12, 2  ;;  %v651_v5 = vld [vmem:[%s1034_s2 + $0x18] sm:$0xff]  ;;  %v650_v8 = vld [vmem:[%s1034_s2 + $0x10] sm:$0xff]  ;;  %s539_s12 = sshll.u32 %s535_s30, 4  ;;  %s540_s12 = int_to_ptr.hbm [resolvable:$true] %s539_s12 }
  0x18   : > { %431 = vmatpush.bf16.msra.mxu0 %v655_v1  ;;  %s962_s29 = scalar_lea.vmem %s1032_s0, %s611_s19  ;;  %s967_s11 = scalar_lea.vmem %s1033_s1, %s611_s19  ;;  %v649_v21 = vld [vmem:[%s1034_s2 + $0x8] sm:$0xff]  ;;  %v648_v30 = vld [vmem:[%s1034_s2] sm:$0xff] }
  0x19   : > { %v722_v6 = vld [vmem:[%s962_s29 + $0x18] sm:$0xff]   ;;  %v725_v9 = vld [vmem:[%s962_s29 + $0x30] sm:$0xff]   ;;  %v657_v11 = vld [vmem:[%s962_s29] sm:$0xff]   ;;  %s806_s14 = sshra.s32 %s540_s12, 4  ;;  %s807_s14 = int_to_ptr.hbm [resolvable:$true] %s806_s14 }
  0x1a   : > { %v729_v7 = vld [vmem:[%s967_s11 + $0x18] sm:$0xff]   ;;  %v732_v10 = vld [vmem:[%s967_s11 + $0x30] sm:$0xff]   ;;  %v689_v12 = vld [vmem:[%s967_s11] sm:$0xff]   ;;  %v670_v13 = vunpack.c.l.bf16 %v722_v6  ;;  %v671_v14 = vunpack.c.h.bf16 %v722_v6  ;;  %v682_v17 = vunpack.c.l.bf16 %v725_v9  ;;  %v683_v18 = vunpack.c.h.bf16 %v725_v9  ;;  %s808_s15 = scalar_lea.hbm %s807_s14, 1  ;;  %p813_p0 = scmp.lt.s32.totalorder %s807_s14, %s1038_s6 }
  0x1b   : > { %736 = vmatpush.bf16.msra.mxu2 %v654_v2  ;;  %737 = vmatpush.bf16.msra.mxu3 %v654_v2  ;;  %v702_v15 = vunpack.c.l.bf16 %v729_v7  ;;  %v703_v16 = vunpack.c.h.bf16 %v729_v7  ;;  %v714_v19 = vunpack.c.l.bf16 %v732_v10  ;;  %v715_v20 = vunpack.c.h.bf16 %v732_v10  ;;  %v723_v36 = vld [vmem:[%s962_s29 + $0x20] sm:$0xff]   ;;  %v726_v38 = vld [vmem:[%s962_s29 + $0x38] sm:$0xff]   ;;  %v720_v40 = vld [vmem:[%s962_s29 + $0x8] sm:$0xff]   ;;  %p809_p11 = scmp.ne.s32.totalorder %s807_s14, %s808_s15  ;;  %p814_p1 = scmp.lt.s32.totalorder %s812_s5, %s808_s15 }
  0x1c   : > { %432 = vmatpush.bf16.msra.mxu0 %v654_v2  ;;  %v658_v22 = vunpack.c.l.bf16 %v657_v11  ;;  %v659_v23 = vunpack.c.h.bf16 %v657_v11  ;;  %v690_v24 = vunpack.c.l.bf16 %v689_v12  ;;  %v691_v25 = vunpack.c.h.bf16 %v689_v12  ;;  %v730_v37 = vld [vmem:[%s967_s11 + $0x20] sm:$0xff]   ;;  %v733_v39 = vld [vmem:[%s967_s11 + $0x38] sm:$0xff]   ;;  %v727_v41 = vld [vmem:[%s967_s11 + $0x8] sm:$0xff]  }
  0x1d   : > { %v345_v26 = vmul.f32 %v702_v15, %v670_v13  ;;  %v346_v27 = vmul.f32 %v703_v16, %v671_v14  ;;  %v351_v28 = vmul.f32 %v714_v19, %v682_v17  ;;  %v352_v29 = vmul.f32 %v715_v20, %v683_v18  ;;  %v724_v63 = vld [vmem:[%s962_s29 + $0x28] sm:$0xff]   ;;  %v721_v1 = vld [vmem:[%s962_s29 + $0x10] sm:$0xff]   ;;  %p810_p12 = pnand %p809_p11, %p933_p5  ;;  %p815_p2 = por %p814_p1, %p813_p0 }
  0x1e   : > { %v339_v31 = vmul.f32 %v690_v24, %v658_v22  ;;  %v340_v32 = vmul.f32 %v691_v25, %v659_v23  ;;  %v674_v42 = vunpack.c.l.bf16 %v723_v36  ;;  %v675_v43 = vunpack.c.h.bf16 %v723_v36  ;;  %v731_v0 = vld [vmem:[%s967_s11 + $0x28] sm:$0xff]   ;;  %v728_v2 = vld [vmem:[%s967_s11 + $0x10] sm:$0xff]   ;;  %v791_v25 = vld [vmem:[%s1035_s3] ss:$0 sm:$0xff]  ;;  %s537_s11 = sshll.u32 %s262_s10, 4  ;;  %s538_s11 = int_to_ptr.vmem [resolvable:$true] %s537_s11 }
  0x1f   : > { %738 = vmatpush.bf16.msra.mxu2 %v653_v3  ;;  %739 = vmatpush.bf16.msra.mxu3 %v653_v3  ;;  %v358_v33 = vpack.c.bf16 %v346_v27, %v345_v26  ;;  %v361_v34 = vpack.c.bf16 %v352_v29, %v351_v28  ;;  %v706_v44 = vunpack.c.l.bf16 %v730_v37  ;;  %v707_v45 = vunpack.c.h.bf16 %v730_v37  ;;  %p811_p13 = pneg %p810_p12 }
  0x20   : > { %433 = vmatpush.bf16.msra.mxu0 %v653_v3  ;;  %v355_v35 = vpack.c.bf16 %v340_v32, %v339_v31  ;;  %v686_v46 = vunpack.c.l.bf16 %v726_v38  ;;  %v687_v47 = vunpack.c.h.bf16 %v726_v38  ;;  %v718_v48 = vunpack.c.l.bf16 %v733_v39 }
  0x21   : > { %v719_v49 = vunpack.c.h.bf16 %v733_v39  ;;  %v662_v50 = vunpack.c.l.bf16 %v720_v40  ;;  %v663_v51 = vunpack.c.h.bf16 %v720_v40  ;;  %v694_v52 = vunpack.c.l.bf16 %v727_v41  ;;  %p816_p3 = pnand %p815_p2, %p811_p13 }
  0x22   : > { %v695_v53 = vunpack.c.h.bf16 %v727_v41  ;;  %v347_v54 = vmul.f32 %v706_v44, %v674_v42  ;;  %v348_v55 = vmul.f32 %v707_v45, %v675_v43  ;;  %v353_v56 = vmul.f32 %v718_v48, %v686_v46 }
  0x23   : > { %740 = vmatpush.bf16.msra.mxu2 %v652_v4  ;;  %741 = vmatpush.bf16.msra.mxu3 %v652_v4  ;;  %v354_v57 = vmul.f32 %v719_v49, %v687_v47  ;;  %v341_v58 = vmul.f32 %v694_v52, %v662_v50  ;;  %v678_v3 = vunpack.c.l.bf16 %v724_v63  ;;  %v711_v6 = vunpack.c.h.bf16 %v731_v0 }
  0x24   : > { %434 = vmatpush.bf16.msra.mxu0 %v652_v4  ;;  %v342_v59 = vmul.f32 %v695_v53, %v663_v51  ;;  %v359_v60 = vpack.c.bf16 %v348_v55, %v347_v54  ;;  %v679_v4 = vunpack.c.h.bf16 %v724_v63  ;;  %v666_v7 = vunpack.c.l.bf16 %v721_v1 }
  0x25   : > { %v362_v61 = vpack.c.bf16 %v354_v57, %v353_v56  ;;  %v698_v9 = vunpack.c.l.bf16 %v728_v2  ;;  %v699_v10 = vunpack.c.h.bf16 %v728_v2 }
  0x26   : > { %v356_v62 = vpack.c.bf16 %v342_v59, %v341_v58  ;;  %v350_v12 = vmul.f32 %v711_v6, %v679_v4 }
  0x27   : > { %742 = vmatpush.bf16.msra.mxu2 %v651_v5  ;;  %743 = vmatpush.bf16.msra.mxu3 %v651_v5  ;;  %v343_v13 = vmul.f32 %v698_v9, %v666_v7 }
  0x28   : > { %435 = vmatpush.bf16.msra.mxu0 %v651_v5  ;;  %v710_v5 = vunpack.c.l.bf16 %v731_v0 }
  0x2a   : > { %v349_v11 = vmul.f32 %v710_v5, %v678_v3 }
  0x2b   : > { %744 = vmatpush.bf16.msra.mxu2 %v650_v8  ;;  %745 = vmatpush.bf16.msra.mxu3 %v650_v8 }
  0x2c   : > { %436 = vmatpush.bf16.msra.mxu0 %v650_v8  ;;  %v667_v8 = vunpack.c.h.bf16 %v721_v1  ;;  %v360_v15 = vpack.c.bf16 %v350_v12, %v349_v11  ;;  %v504_v12 = vld [vmem:[%s1036_s4] sm:$0x1] }
  0x2e   : > { %v344_v14 = vmul.f32 %v699_v10, %v667_v8 }
  0x2f   : > { %746 = vmatpush.bf16.msra.mxu2 %v649_v21  ;;  %747 = vmatpush.bf16.msra.mxu3 %v649_v21 }
  0x30   : > { %437 = vmatpush.bf16.msra.mxu0 %v649_v21  ;;  %v357_v16 = vpack.c.bf16 %v344_v14, %v343_v13 }
  0x33   : > { %748 = vmatpush.bf16.msra.mxu2 %v648_v30  ;;  %749 = vmatpush.bf16.msra.mxu3 %v648_v30 }
  0x34   : > { %438 = vmatpush.bf16.msra.mxu0 %v648_v30 }
  0x36   : > { %454 = vmatmul.bf16.vlgmr.msra.gmra.mxu2 %v358_v33  ;;  %469 = vmatmul.bf16.vlgmr.msra.gmra.mxu3 %v361_v34 }
  0x37   : > { %439 = vmatmul.bf16.vlgmr.msra.gmra.mxu0 %v355_v35 }
  0x46   : > { %459 = vmatmul.bf16.gmra.mxu2 %v359_v60  ;;  %474 = vmatmul.bf16.gmra.mxu3 %v362_v61  ;;  %v505_v61 = vld [vmem:[#allocation2] sm:$0x1] }
  0x47   : > { %444 = vmatmul.bf16.gmra.mxu0 %v356_v62  ;;  %v856_v62 = vmov 0  }
  0x48   : > { %790 = vset.pattern.permute.xlu0 %v856_v62 }
  0x49   : > { %508 = vperm.xlu0 %790, %v505_v61  }
  0x56   : > { %464 = vmatmul.bf16.gmra.mxu2 %v360_v15 }
  0x57   : > { %449 = vmatmul.bf16.gmra.mxu0 %v357_v16 }
  0xb4   : > { %v440_v19 = vpop.f32.mrf.mxu0 }
  0xb5   : > { %v441_v6 = vadd.f32 %v791_v25, %v440_v19 }
  0xb7   : > { %v480_v9 = vmax.f32 %v441_v6, 0.0 }
  0xb9   : > { %v455_v17 = vpop.f32.mrf.mxu2  ;;  %v470_v18 = vpop.f32.mrf.mxu3 }
  0xba   : > { %v471_v35 = vadd.f32 %v791_v25, %v470_v18  ;;  %v456_v54 = vadd.f32 %v791_v25, %v455_v17 }
  0xbb   : > { %v509_v13 = vpop.permute.xlu0 %508 }
  0xbc   : > { %v442_v24 = vpop.f32.mrf.mxu0  ;;  %v492_v38 = vmax.f32 %v471_v35, 0.0  ;;  %v486_v57 = vmax.f32 %v456_v54, 0.0  ;;  %v511_v14 = vperm.slane %v509_v13, 0 }
  0xbd   : > { %v443_v7 = vadd.f32 %v791_v25, %v442_v24 }
  0xbf   : > { %v481_v10 = vmax.f32 %v443_v7, 0.0 }
  0xc1   : > { %v457_v20 = vpop.f32.mrf.mxu2  ;;  %v472_v21 = vpop.f32.mrf.mxu3  ;;  %v496_v11 = vpack.c.bf16 %v481_v10, %v480_v9 }
  0xc2   : > { %v473_v33 = vadd.f32 %v791_v25, %v472_v21  ;;  %v458_v52 = vadd.f32 %v791_v25, %v457_v20 }
  0xc4   : > { %v445_v32 = vpop.f32.mrf.mxu0  ;;  %v493_v37 = vmax.f32 %v473_v33, 0.0  ;;  %v487_v55 = vmax.f32 %v458_v52, 0.0 }
  0xc5   : > { %v446_v1 = vadd.f32 %v791_v25, %v445_v32 }
  0xc6   : > { %v502_v39 = vpack.c.bf16 %v493_v37, %v492_v38  ;;  %v499_v60 = vpack.c.bf16 %v487_v55, %v486_v57 }
  0xc7   : > { %v482_v4 = vmax.f32 %v446_v1, 0.0 }
  0xc9   : > { %v460_v22 = vpop.f32.mrf.mxu2  ;;  %v475_v23 = vpop.f32.mrf.mxu3 }
  0xca   : > { %v476_v26 = vadd.f32 %v791_v25, %v475_v23  ;;  %v461_v48 = vadd.f32 %v791_v25, %v460_v22 }
  0xcc   : > { %v494_v30 = vmax.f32 %v476_v26, 0.0  ;;  %v447_v40 = vpop.f32.mrf.mxu0  ;;  %v488_v51 = vmax.f32 %v461_v48, 0.0 }
  0xcd   : > { %v448_v2 = vadd.f32 %v791_v25, %v447_v40 }
  0xcf   : > { %v483_v5 = vmax.f32 %v448_v2, 0.0 }
  0xd1   : > { %v462_v27 = vpop.f32.mrf.mxu2  ;;  %v477_v28 = vpop.f32.mrf.mxu3  ;;  %v497_v8 = vpack.c.bf16 %v483_v5, %v482_v4 }
  0xd2   : > { %v478_v29 = vadd.f32 %v791_v25, %v477_v28  ;;  %v463_v46 = vadd.f32 %v791_v25, %v462_v27 }
  0xd4   : > { %v495_v31 = vmax.f32 %v478_v29, 0.0  ;;  %v450_v49 = vpop.f32.mrf.mxu0  ;;  %v489_v50 = vmax.f32 %v463_v46, 0.0 }
  0xd5   : > { %v451_v58 = vadd.f32 %v791_v25, %v450_v49 }
  0xd6   : > { %v503_v34 = vpack.c.bf16 %v495_v31, %v494_v30  ;;  %v500_v53 = vpack.c.bf16 %v489_v50, %v488_v51 }
  0xd7   : > { %v484_v63 = vmax.f32 %v451_v58, 0.0 }
  0xd8   : > { %512 = vmatpush.bf16.xpose.msra.mxu1 %v503_v34 }
  0xd9   : > { %v465_v36 = vpop.f32.mrf.mxu2 }
  0xda   : > { %v466_v41 = vadd.f32 %v791_v25, %v465_v36 }
  0xdc   : > { %v490_v44 = vmax.f32 %v466_v41, 0.0  ;;  %v452_v56 = vpop.f32.mrf.mxu0 }
  0xdd   : > { %v453_v59 = vadd.f32 %v791_v25, %v452_v56 }
  0xdf   : > { %v485_v0 = vmax.f32 %v453_v59, 0.0 }
  0xe0   : > { %513 = vmatpush.bf16.xpose.msra.mxu1 %v502_v39 }
  0xe1   : > { %v467_v42 = vpop.f32.mrf.mxu2  ;;  %v498_v3 = vpack.c.bf16 %v485_v0, %v484_v63 }
  0xe2   : > { %v468_v43 = vadd.f32 %v791_v25, %v467_v42 }
  0xe4   : > { %v491_v45 = vmax.f32 %v468_v43, 0.0 }
  0xe6   : > { %v501_v47 = vpack.c.bf16 %v491_v45, %v490_v44 }
  0xe8   : > { %514 = vmatpush.bf16.xpose.msra.mxu1 %v501_v47 }
  0xf0   : > { %515 = vmatpush.bf16.xpose.msra.mxu1 %v500_v53 }
  0xf8   : > { %516 = vmatpush.bf16.xpose.msra.mxu1 %v499_v60 }
 0x100   : > { %517 = vmatpush.bf16.xpose.msra.mxu1 %v498_v3 }
 0x108   : > { %518 = vmatpush.bf16.xpose.msra.mxu1 %v497_v8 }
 0x110   : > { %519 = vmatpush.bf16.xpose.msra.mxu1 %v496_v11 }
 0x117   : > { %520 = vmatmul.bf16.vlgmr.msra.gmra.mxu1 %v504_v12 }
 0x194   : > { %v521_v15 = vpop.f32.mrf.mxu1 }
 0x195   : > { %v522_v16 = vadd.f32 %v521_v15, %v511_v14 }
 0x197   : > { %525 = vst [vmem:[%s262_s10] sm:$0x1] %v522_v16 }
 0x198   : > { %819 = shalt.err (!%p816_p3)
}
 0x199   : > { %750 = dma.vmem_to_hbm [thread:$0]  (%p933_p5), %s538_s11, 16, %s540_s12, %s527_s13  }
 0x19c   : > { %v523_v17 = vpop.f32.mrf.mxu1 }
 0x19d PF: > { %p756_p4 = scmp.ge.s32.totalorder %s854_s26, 2  ;;  %s551_s20 = sand.u32 1, %s842_s23  }
 0x19e   : > { %s552_s21 = scalar_lea.sflag [#allocation4], %s551_s20 }
 0x19f   : > { %p753_p7 = pnand %p756_p4, %p937_p6 }
 0x1a1   : > { %p754_p8 = pneg %p753_p7 }
 0x1a3   : > { %837 = dma.done.wait (%p754_p8), %s552_s21, 16  }
 0x1a4   : > { %839 = vsyncadd (%p754_p8), %s552_s21, 4294967280  ;;  %p18_p9 = scmp.ge.s32.totalorder %s920_s28, 4   ;;  %s1041_s23 = smov %s846_s24 }
 0x1a5   : > { %s1042_s24 = smov %s850_s25  ;;  %s1043_s25 = smov %s931_s7 }
 0x1a6   : > { %s1044_s26 = smov %s920_s28  ;;  %20 = sbr.rel (!%p18_p9) target bundleno = 6 (0x6), region = 82 }
 0x1ab   :  { %557 = vsyncpa [#allocation4], 1 }
 0x1ac   :  { %559 = vsyncpa [#allocation4 + $0x1], 1 }

</bundles_post_ra>
